<compile_context>
chip_gen: v6e
topology: v6e:2x2x1
jax: 0.10.0
libtpu: 0.0.40
codegen_flags: <defaults>
</compile_context>

<pallas_src>
import functools

import jax
import jax.numpy as jnp
import numpy as np
from jax.experimental import pallas as pl
from jax.experimental.pallas import tpu as pltpu

_EPS = 1e-5  # torch.nn.LayerNorm default eps


def _round_up(x, m):
    return ((x + m - 1) // m) * m


def _transition_kernel(x_ref, ln_w_ref, ln_b_ref, w12_ref, w3_ref, o_ref,
                       *, hidden):
    # ---- LayerNorm (torch semantics: biased variance, eps=1e-5, affine) ----
    x = x_ref[...].astype(jnp.float32)                        # (tm, c)
    m = jnp.mean(x, axis=-1, keepdims=True)
    v = jnp.mean((x - m) * (x - m), axis=-1, keepdims=True)
    xn = (x - m) * jax.lax.rsqrt(v + _EPS)
    xn = xn * ln_w_ref[...].astype(jnp.float32) + ln_b_ref[...].astype(jnp.float32)

    # ---- fused a/b projection: one (tm, c) x (c, 2*hidden) MXU matmul ----
    # bf16 inputs, f32 accumulation (native MXU path).
    ab = jnp.dot(xn.astype(w12_ref.dtype), w12_ref[...],
                 preferred_element_type=jnp.float32)           # (tm, 2*hidden)
    a = ab[:, :hidden]                                         # lane-aligned slice
    b = ab[:, hidden:]
    h = jax.nn.silu(a) * b                                     # f32 on VPU/EUP

    # ---- output projection (hidden -> c) ----
    out = jnp.dot(h.astype(w3_ref.dtype), w3_ref[...],
                  preferred_element_type=jnp.float32)          # (tm, c)
    o_ref[...] = out.astype(o_ref.dtype)


def prepare_params(params, matmul_dtype=jnp.bfloat16):
    """One-time param prep: fuse w1|w2 and cast matmul weights to bf16.

    Hoisted out of the per-call path so the concat/cast HBM traffic is not
    paid on every forward call.
    """
    c = params["ln_w"].shape[0]
    return dict(
        ln_w=params["ln_w"].reshape(1, c).astype(jnp.float32),
        ln_b=params["ln_b"].reshape(1, c).astype(jnp.float32),
        w12=jnp.concatenate([params["w1"], params["w2"]],
                            axis=1).astype(matmul_dtype),       # (c, 2*hidden)
        w3=params["w3"].astype(matmul_dtype),                   # (hidden, c)
    )


def transition(x, prepared, *, block_rows=512):
    """Pallas forward of the Transition module.

    x: (..., c). prepared: output of prepare_params() — ln_w/ln_b (1, c) f32,
    w12 (c, 2*hidden) bf16, w3 (hidden, c) bf16.
    """
    orig_shape = x.shape
    c = orig_shape[-1]
    x2 = x.reshape(-1, c)
    M = x2.shape[0]

    w12, w3 = prepared["w12"], prepared["w3"]
    ln_w, ln_b = prepared["ln_w"], prepared["ln_b"]
    hidden = w3.shape[0]
    assert w12.shape == (c, 2 * hidden) and w3.shape == (hidden, c)
    # Lane-tile alignment: keeps a/b slices of the fused matmul zero-cost and
    # the (tm, c) output stores unmasked.
    assert hidden % 128 == 0, "hidden (= n*c) must be a multiple of 128"
    assert c % 8 == 0, "c must be a multiple of 8"

    # Row tile: as large as block_rows allows, but keep the grid >= 2 steps so
    # the "parallel" axis can be sharded across both v7x TensorCores.
    tm = max(8, min(block_rows, _round_up(pl.cdiv(M, 2), 8), _round_up(M, 8)))
    grid = (pl.cdiv(M, tm),)

    # VMEM budget: double-buffered x/out tiles + single-buffered weights +
    # f32 intermediates (xn, ab, h) and their bf16 MXU copies, with headroom.
    x_bytes = jnp.dtype(x.dtype).itemsize
    w_bytes = jnp.dtype(w12.dtype).itemsize
    est = (2 * tm * c * x_bytes               # x tile (double-buffered)
           + 2 * tm * c * x_bytes             # out tile (double-buffered)
           + 3 * c * hidden * w_bytes         # w12 + w3 (single-buffered)
           + 2 * c * 4                        # LN scale / bias
           + tm * (c + 3 * hidden) * 4        # xn, ab, h in f32
           + tm * 3 * hidden * w_bytes)       # bf16 copies fed to the MXU
    vmem_limit = int(min(max(2 * est + (2 << 20), 32 << 20), 100 << 20))

    flops = 2 * M * c * (2 * hidden) + 2 * M * hidden * c + 10 * M * c
    bytes_accessed = (2 * M * c * x_bytes            # x in + y out
                      + 3 * c * hidden * w_bytes     # weights
                      + 2 * c * 4)                   # LN params
    cost = pl.CostEstimate(flops=flops,
                           transcendentals=M * (hidden + c),
                           bytes_accessed=bytes_accessed)

    kernel = functools.partial(_transition_kernel, hidden=hidden)
    single = pl.Buffered(1)  # grid-invariant operands: no double-buffering

    out = pl.pallas_call(
        kernel,
        out_shape=jax.ShapeDtypeStruct((M, c), x.dtype),
        grid=grid,
        in_specs=[
            pl.BlockSpec((tm, c), lambda i: (i, 0)),                 # x row tile
            pl.BlockSpec((1, c), lambda i: (0, 0),
                         pipeline_mode=single),                      # ln weight
            pl.BlockSpec((1, c), lambda i: (0, 0),
                         pipeline_mode=single),                      # ln bias
            pl.BlockSpec((c, 2 * hidden), lambda i: (0, 0),
                         pipeline_mode=single),                      # fused w1|w2
            pl.BlockSpec((hidden, c), lambda i: (0, 0),
                         pipeline_mode=single),                      # w3
        ],
        out_specs=pl.BlockSpec((tm, c), lambda i: (i, 0)),
        compiler_params=pltpu.CompilerParams(
            dimension_semantics=("parallel",),
            vmem_limit_bytes=vmem_limit),
        cost_estimate=cost,
    )(x2, ln_w, ln_b, w12, w3)
    return out.reshape(orig_shape)


def init_params(key, c, n):
    """Deterministic synthetic parameters (weights pre-transposed to (in, out))."""
    k1, k2, k3, k4, k5 = jax.random.split(key, 5)

    def w(k, shape, scale=0.1):
        return (scale * jax.random.normal(k, shape)).astype(jnp.float32)

    return dict(
        ln_w=(1.0 + w(k1, (c,))),        # nn.LayerNorm weight
        ln_b=w(k2, (c,)),                # nn.LayerNorm bias
        w1=w(k3, (c, n * c)),            # linear_no_bias_1
        w2=w(k4, (c, n * c)),            # linear_no_bias_2
        w3=w(k5, (n * c, c)),            # linear_no_bias_3
    )


def reference(x, p):
    """Plain-JAX replica of the PyTorch Transition.forward, for verification."""
    m = jnp.mean(x, axis=-1, keepdims=True)
    v = jnp.mean((x - m) ** 2, axis=-1, keepdims=True)
    xn = (x - m) * jax.lax.rsqrt(v + _EPS) * p["ln_w"] + p["ln_b"]
    a = xn @ p["w1"]
    b = xn @ p["w2"]
    return (jax.nn.silu(a) * b) @ p["w3"]


if __name__ == "__main__":
    B, N_token, c, n = 2, 128, 128, 4   # hidden = n*c = 512; M = 256 rows

    key = jax.random.PRNGKey(0)
    kx, kp = jax.random.split(key, 2)
    x = jax.random.normal(kx, (B, N_token, c), jnp.float32)
    params = init_params(kp, c, n)
    prepared = prepare_params(params)    # one-time weight fusion + bf16 cast

    out = transition(x, prepared)        # grid=(2,): both v7x TCs get a tile
    out = jax.block_until_ready(out)

    ref = reference(x, params)
    assert out.shape == (B, N_token, c)
    assert bool(jnp.all(jnp.isfinite(out)))
    # Kernel uses bf16 MXU inputs with f32 accumulation; compare at bf16-level
    # tolerance against the f32 reference.
    np.testing.assert_allclose(np.asarray(out), np.asarray(ref),
                               rtol=3e-2, atol=3e-2)
    print("KERNEL_OK")
</pallas_src>

<mosaic_0001>
module attributes {stable_mosaic.version = 11 : i64} {
  func.func @_transition_kernel(%arg0: i32, %arg1: memref<128x128xf32, #tpu.memory_space<vmem>>, %arg2: memref<1x128xf32, #tpu.memory_space<vmem>>, %arg3: memref<1x128xf32, #tpu.memory_space<vmem>>, %arg4: memref<128x1024xbf16, #tpu.memory_space<vmem>>, %arg5: memref<512x128xbf16, #tpu.memory_space<vmem>>, %arg6: memref<128x128xf32, #tpu.memory_space<vmem>>) attributes {dimension_semantics = [#tpu.dimension_semantics<parallel>], iteration_bounds = array<i64: 2>, scalar_prefetch = 0 : i64, scratch_operands = 0 : i64, tpu.core_type = #tpu.core_type<tc>, window_params = [{transform_indices = @transform_0, window_bounds = array<i64: 128, 128>}, {pipeline_mode = #tpu.pipeline_mode<synchronous>, transform_indices = @transform_1, window_bounds = array<i64: 1, 128>}, {pipeline_mode = #tpu.pipeline_mode<synchronous>, transform_indices = @transform_2, window_bounds = array<i64: 1, 128>}, {pipeline_mode = #tpu.pipeline_mode<synchronous>, transform_indices = @transform_3, window_bounds = array<i64: 128, 1024>}, {pipeline_mode = #tpu.pipeline_mode<synchronous>, transform_indices = @transform_4, window_bounds = array<i64: 512, 128>}, {transform_indices = @transform_5, window_bounds = array<i64: 128, 128>}]} {
    %c0 = arith.constant 0 : index
    %c0_0 = arith.constant 0 : index
    %0 = vector.load %arg1[%c0, %c0_0] : memref<128x128xf32, #tpu.memory_space<vmem>>, vector<128x128xf32>
    %cst = arith.constant dense<0.000000e+00> : vector<128xf32>
    %1 = vector.multi_reduction <add>, %0, %cst [1] : vector<128x128xf32> to vector<128xf32>
    %2 = vector.shape_cast %1 : vector<128xf32> to vector<128x1xf32>
    %cst_1 = arith.constant 1.280000e+02 : f32
    %3 = vector.broadcast %cst_1 : f32 to vector<128x1xf32>
    %4 = arith.divf %2, %3 : vector<128x1xf32>
    %5 = vector.broadcast %4 : vector<128x1xf32> to vector<128x128xf32>
    %6 = arith.subf %0, %5 : vector<128x128xf32>
    %7 = vector.broadcast %4 : vector<128x1xf32> to vector<128x128xf32>
    %8 = arith.subf %0, %7 : vector<128x128xf32>
    %9 = arith.mulf %6, %8 : vector<128x128xf32>
    %cst_2 = arith.constant dense<0.000000e+00> : vector<128xf32>
    %10 = vector.multi_reduction <add>, %9, %cst_2 [1] : vector<128x128xf32> to vector<128xf32>
    %11 = vector.shape_cast %10 : vector<128xf32> to vector<128x1xf32>
    %cst_3 = arith.constant 1.280000e+02 : f32
    %12 = vector.broadcast %cst_3 : f32 to vector<128x1xf32>
    %13 = arith.divf %11, %12 : vector<128x1xf32>
    %14 = vector.broadcast %4 : vector<128x1xf32> to vector<128x128xf32>
    %15 = arith.subf %0, %14 : vector<128x128xf32>
    %cst_4 = arith.constant 9.99999974E-6 : f32
    %16 = vector.broadcast %cst_4 : f32 to vector<128x1xf32>
    %17 = arith.addf %13, %16 : vector<128x1xf32>
    %18 = math.rsqrt %17 : vector<128x1xf32>
    %19 = vector.broadcast %18 : vector<128x1xf32> to vector<128x128xf32>
    %20 = arith.mulf %15, %19 : vector<128x128xf32>
    %c0_5 = arith.constant 0 : index
    %c0_6 = arith.constant 0 : index
    %21 = vector.load %arg2[%c0_5, %c0_6] : memref<1x128xf32, #tpu.memory_space<vmem>>, vector<1x128xf32>
    %22 = vector.broadcast %21 : vector<1x128xf32> to vector<128x128xf32>
    %23 = arith.mulf %20, %22 : vector<128x128xf32>
    %c0_7 = arith.constant 0 : index
    %c0_8 = arith.constant 0 : index
    %24 = vector.load %arg3[%c0_7, %c0_8] : memref<1x128xf32, #tpu.memory_space<vmem>>, vector<1x128xf32>
    %25 = vector.broadcast %24 : vector<1x128xf32> to vector<128x128xf32>
    %26 = arith.addf %23, %25 : vector<128x128xf32>
    %27 = arith.truncf %26 : vector<128x128xf32> to vector<128x128xbf16>
    %c0_9 = arith.constant 0 : index
    %c0_10 = arith.constant 0 : index
    %28 = vector.load %arg4[%c0_9, %c0_10] : memref<128x1024xbf16, #tpu.memory_space<vmem>>, vector<128x1024xbf16>
    %cst_11 = arith.constant dense<0.000000e+00> : vector<128x1024xf32>
    %29 = tpu.matmul %27, %28, %cst_11 {dimension_numbers = #tpu.dot_dimension_numbers<[1], [0], [0], [1], [0, 0, 1, 1], [], []>} : vector<128x128xbf16>, vector<128x1024xbf16>, vector<128x1024xf32> -> vector<128x1024xf32>
    %30 = vector.extract_strided_slice %29 {offsets = [0, 0], sizes = [128, 512], strides = [1, 1]} : vector<128x1024xf32> to vector<128x512xf32>
    %31 = vector.extract_strided_slice %29 {offsets = [0, 512], sizes = [128, 512], strides = [1, 1]} : vector<128x1024xf32> to vector<128x512xf32>
    %32 = arith.negf %30 : vector<128x512xf32>
    %33 = math.exp %32 : vector<128x512xf32>
    %cst_12 = arith.constant 1.000000e+00 : f32
    %34 = vector.broadcast %cst_12 : f32 to vector<128x512xf32>
    %35 = arith.addf %34, %33 : vector<128x512xf32>
    %36 = arith.divf %34, %35 : vector<128x512xf32>
    %37 = arith.mulf %30, %36 : vector<128x512xf32>
    %38 = arith.mulf %37, %31 : vector<128x512xf32>
    %39 = arith.truncf %38 : vector<128x512xf32> to vector<128x512xbf16>
    %c0_13 = arith.constant 0 : index
    %c0_14 = arith.constant 0 : index
    %40 = vector.load %arg5[%c0_13, %c0_14] : memref<512x128xbf16, #tpu.memory_space<vmem>>, vector<512x128xbf16>
    %cst_15 = arith.constant dense<0.000000e+00> : vector<128x128xf32>
    %41 = tpu.matmul %39, %40, %cst_15 {dimension_numbers = #tpu.dot_dimension_numbers<[1], [0], [0], [1], [0, 0, 1, 1], [], []>} : vector<128x512xbf16>, vector<512x128xbf16>, vector<128x128xf32> -> vector<128x128xf32>
    %c0_16 = arith.constant 0 : index
    %c0_17 = arith.constant 0 : index
    %42 = vector.load %arg6[%c0_16, %c0_17] : memref<128x128xf32, #tpu.memory_space<vmem>>, vector<128x128xf32>
    tpu.vector_store %arg6[%c0_16, %c0_17], %41 {strides = array<i32>} : memref<128x128xf32, #tpu.memory_space<vmem>>, vector<128x128xf32>,
    return
  }
  func.func @transform_0(%arg0: i32) -> (i32, i32) {
    %c0_i32 = arith.constant 0 : i32
    %c0_i32_0 = arith.constant 0 : i32
    return %arg0, %c0_i32 : i32, i32
  }
  func.func @transform_1(%arg0: i32) -> (i32, i32) {
    %c0_i32 = arith.constant 0 : i32
    %c0_i32_0 = arith.constant 0 : i32
    %c0_i32_1 = arith.constant 0 : i32
    return %c0_i32, %c0_i32_0 : i32, i32
  }
  func.func @transform_2(%arg0: i32) -> (i32, i32) {
    %c0_i32 = arith.constant 0 : i32
    %c0_i32_0 = arith.constant 0 : i32
    %c0_i32_1 = arith.constant 0 : i32
    return %c0_i32, %c0_i32_0 : i32, i32
  }
  func.func @transform_3(%arg0: i32) -> (i32, i32) {
    %c0_i32 = arith.constant 0 : i32
    %c0_i32_0 = arith.constant 0 : i32
    %c0_i32_1 = arith.constant 0 : i32
    return %c0_i32, %c0_i32_0 : i32, i32
  }
  func.func @transform_4(%arg0: i32) -> (i32, i32) {
    %c0_i32 = arith.constant 0 : i32
    %c0_i32_0 = arith.constant 0 : i32
    %c0_i32_1 = arith.constant 0 : i32
    return %c0_i32, %c0_i32_0 : i32, i32
  }
  func.func @transform_5(%arg0: i32) -> (i32, i32) {
    %c0_i32 = arith.constant 0 : i32
    %c0_i32_0 = arith.constant 0 : i32
    return %arg0, %c0_i32 : i32, i32
  }
}

</mosaic_0001>

<bundles_post_ra>
// kernel: tpu_custom_call.1
= control target key start
LH: loop header
LB: loop body
LE: loop exit
PB: predicated region body
PF: predicated region fallthrough
CT: control target
= control target key end

     0   :  { %10 = vsyncpa [#allocation3], 0  ;;  %s4289_s0 = inlined_call_operand.hbm [shape: f32[256,128], index: 0, kind: input, shape index: {}]   ;;  %s4290_s1 = inlined_call_operand.vmem [shape: f32[1,128], index: 1, kind: input, shape index: {}]   ;;  %s4291_s2 = inlined_call_operand.vmem [shape: f32[1,128], index: 2, kind: input, shape index: {}]   ;;  %s4292_s3 = inlined_call_operand.hbm [shape: bf16[128,1024], index: 3, kind: input, shape index: {}]   ;;  %s4293_s4 = inlined_call_operand.hbm [shape: bf16[512,128], index: 4, kind: input, shape index: {}]   ;;  %s4294_s5 = inlined_call_operand.hbm [shape: f32[256,128], index: 5, kind: output, shape index: {}]  }
   0x1   :  { %12 = vsyncpa [#allocation3 + $0x1], 0 }
   0x2   :  { %13 = vsyncpa [#allocation6], 0 }
   0x3   :  { %14 = vsyncpa [#allocation4], 0 }
   0x4   :  { %16 = vsyncpa [#allocation4 + $0x1], 0  ;;  %s3373_s18 = smov 0   ;;  %s3375_s19 = smov 0  }
   0x5   :  { %s3377_s20 = smov 0   ;;  %s3379_s21 = smov 0  }
   0x6 LB: > { %s3394_s22 = sadd.s32 4294967295, %s3328_s21   ;;  %s2474_s23 = sadd.s32 4294967294, %s3328_s21   ;;  %s3328_s21 = sphi %s3379_s21, %s4428_s21   ;;  %s3324_s20 = sphi %s3377_s20, %s4427_s20   ;;  %s3320_s19 = sphi %s3375_s19, %s4426_s19   ;;  %s3316_s18 = sphi %s3373_s18, %s4425_s18  }
   0x7   : > { %p42_p0 = scmp.ne.s32.totalorder %s3320_s19, %s3316_s18  ;;  %p4295_p1 = scmp.eq.s32.totalorder %s3394_s22, 0 }
   0x8   : > { %p156_p3 = scmp.eq.s32.totalorder %s2474_s23, 1  ;;  %p2475_p5 = scmp.ge.s32.totalorder %s3328_s21, 1 }
   0x9   : > { %p3403_p4 = por %p4295_p1, %p42_p0  ;;  %p163_p7 = scmp.lt.s32.totalorder %s3328_s21, 3 }
   0xa   : > { %p3408_p6 = por %p156_p3, %p42_p0  ;;  %s3330_s27 = smov [#allocation5]  }
   0xb   : > { %s4336_s24 = scalar_select %p3403_p4, 1, 0 }
   0xc   : > { %s4337_s25 = scalar_select %p3408_p6, 1, 0 }
   0xd   : > { %p3413_p8 = pnand %p2475_p5, %p163_p7  ;;  %s181_s28 = sshll.u32 %s3330_s27, 4  ;;  %s182_s28 = int_to_ptr.vmem [resolvable:$true] %s181_s28 }
   0xe   : > { %s3331_s30 = smov [#allocation7]   ;;  %s3191_s7 = scalar_lea.vmem %s182_s28, 8192 }
   0xf   : > { %s4338_s26 = scalar_select %p3413_p8, 1, 0 }
  0x10   : > { %p2796_p9 = pneg %p3413_p8  ;;  %s194_s6 = sshll.u32 %s3331_s30, 4  ;;  %s195_s6 = int_to_ptr.vmem [resolvable:$true] %s194_s6 }
  0x11   : > { %p3192_p13 = scmp.ne.s32.totalorder %s182_s28, %s3191_s7  ;;  %p3199_p5 = scmp.lt.s32.totalorder %s182_s28, %s182_s28 }
  0x12   : > { %p3422_p11 = pnand %p2796_p9, %p4295_p1  ;;  %p3200_p7 = scmp.lt.s32.totalorder %s3191_s7, %s3191_s7 }
  0x14   : > { %p3182_p12 = pneg %p3422_p11  ;;  %p3201_p10 = por %p3200_p7, %p3199_p5 }
  0x16   : > { %p3194_p0 = pnand %p3192_p13, %p3182_p12 }
  0x18   : > { %p3195_p3 = pneg %p3194_p0 }
  0x1a   : > { %p3202_p9 = pnand %p3201_p10, %p3195_p3 }
  0x1c   : > { %3205 = shalt.err (!%p3202_p9)
}
  0x1d   : > { %s3332_s8 = smov 512   ;;  %s3333_s9 = smov 32  }
  0x1e   : > { %2799 = dma.hbm_to_vmem [thread:$0]  (!%p3422_p11), %s4292_s3, 8192, %s182_s28, [#allocation6], %s3332_s8, %s3332_s8, %s3333_s9  }
  0x1f   : > { %s3217_s12 = scalar_lea.vmem %s195_s6, 4096  ;;  %p3225_p2 = scmp.lt.s32.totalorder %s195_s6, %s195_s6 }
  0x20   : > { %p3218_p1 = scmp.ne.s32.totalorder %s195_s6, %s3217_s12  ;;  %p3226_p6 = scmp.lt.s32.totalorder %s3217_s12, %s3217_s12 }
  0x22   : > { %p3220_p13 = pnand %p3218_p1, %p3182_p12  ;;  %p3227_p5 = por %p3226_p6, %p3225_p2 }
  0x24   : > { %p3221_p0 = pneg %p3220_p13 }
  0x26   : > { %p3228_p10 = pnand %p3227_p5, %p3221_p0 }
  0x28   : > { %3231 = shalt.err (!%p3228_p10)
}
  0x29   : > { %s3334_s13 = smov 64   ;;  %s3335_s14 = smov 4  }
  0x2a   : > { %2802 = dma.hbm_to_vmem [thread:$0]  (!%p3422_p11), %s4293_s4, 4096, %s195_s6, [#allocation6], %s3334_s13, %s3334_s13, %s3335_s14  }
  0x2b   : > { %s3445_s17 = sadd.s32 1, %s3328_s21   ;;  %s29_s27 = sadd.s32 1, %s3324_s20 }
  0x2c   : > { %s26_s23 = ssub.s32 %s3328_s21, %s3445_s17  ;;  %p36_p2 = scmp.ne.s32.totalorder %s3324_s20, %s3320_s19 }
  0x2d   : > { %p27_p1 = scmp.eq.s32.totalorder %s26_s23, 0  ;;  %p37_p6 = scmp.eq.s32.totalorder %s3328_s21, 0 }
  0x2e   : > { %p4340_p3 = scmp.eq.s32.totalorder %s3394_s22, 1  ;;  %p2813_p9 = scmp.lt.s32.totalorder %s3328_s21, 2 }
  0x2f   : > { %s3454_s28 = scalar_select %p27_p1, %s3324_s20, %s29_s27  }
  0x30   : > { %p38_p12 = por %p37_p6, %p36_p2  ;;  %p3458_p7 = por %p4340_p3, %p36_p2 }
  0x31   : > { %s208_s29 = sand.u32 1, %s3324_s20   ;;  %s2654_s6 = sshll.u32 %s3328_s21, 11 }
  0x32   : > { %s4341_s30 = scalar_select %p3458_p7, 1, 0 }
  0x33   : > { %s2479_s7 = sshll.u32 %s208_s29, 7  ;;  %s3468_s10 = scalar_lea.hbm %s4289_s0, %s2654_s6 }
  0x34   : > { %s212_s11 = scalar_lea.vmem [#allocation2], %s2479_s7  ;;  %p3472_p11 = pnand %p2813_p9, %p38_p12 }
  0x35   : > { %s219_s12 = sshll.u32 %s212_s11, 4  ;;  %s3476_s14 = scalar_lea.sflag [#allocation3], %s208_s29  ;;  %s3470_s12 = int_to_ptr.vmem [resolvable:$true] %s219_s12 }
  0x36   : > { %s3232_s15 = scalar_lea.hbm %s3468_s10, 2048  ;;  %p3234_p0 = pneg %p3472_p11 }
  0x37   : > { %p3233_p13 = scmp.ne.s32.totalorder %s3468_s10, %s3232_s15  ;;  %s3237_s27 = scalar_lea.hbm %s4289_s0, 4096 }
  0x38   : > { %p3238_p1 = scmp.lt.s32.totalorder %s3468_s10, %s4289_s0  ;;  %p3239_p2 = scmp.lt.s32.totalorder %s3237_s27, %s3232_s15 }
  0x39   : > { %p3235_p5 = pnand %p3234_p0, %p3233_p13 }
  0x3a   : > { %p3240_p6 = por %p3239_p2, %p3238_p1 }
  0x3b   : > { %p3236_p10 = pneg %p3235_p5 }
  0x3d   : > { %p3241_p12 = pnand %p3240_p6, %p3236_p10 }
  0x3f   : > { %3244 = shalt.err (!%p3241_p12)
}
  0x40   : > { %s3245_s29 = scalar_lea.vmem %s3470_s12, 2048  ;;  %s3336_s8 = smov [#allocation2]  }
  0x41   : > { %p3246_p3 = scmp.ne.s32.totalorder %s3470_s12, %s3245_s29  ;;  %s3250_s9 = sshll.u32 %s3336_s8, 4  ;;  %s3251_s9 = int_to_ptr.vmem [resolvable:$false] %s3250_s9 }
  0x42   : > { %s3252_s11 = scalar_lea.vmem %s3251_s9, 4096  ;;  %p3253_p5 = scmp.lt.s32.totalorder %s3470_s12, %s3251_s9 }
  0x43   : > { %p3248_p9 = pnand %p3246_p3, %p3234_p0  ;;  %p3254_p7 = scmp.lt.s32.totalorder %s3252_s11, %s3245_s29 }
  0x45   : > { %p3249_p13 = pneg %p3248_p9  ;;  %p3255_p4 = por %p3254_p7, %p3253_p5 }
  0x47   : > { %p3256_p8 = pnand %p3255_p4, %p3249_p13 }
  0x49   : > { %3259 = shalt.err (!%p3256_p8)
}
  0x4a   : > { %s3337_s15 = smov 128   ;;  %s3338_s16 = smov 8  }
  0x4b   : > { %2806 = dma.hbm_to_vmem [thread:$0]  (!%p3472_p11), %s3468_s10, 2048, %s3470_s12, %s3476_s14, %s3337_s15, %s3337_s15, %s3338_s16  }
  0x4c   : > { %p4343_p0 = scmp.ne.s32.totalorder %s4338_s26, 0 }
  0x4e   : > { %231 = sbr.rel (%p4343_p0) target bundleno = 963 (0x3c3), region = 40 }
  0x53   : > { %s3500_s23 = sand.u32 1, %s3320_s19   ;;  %p4344_p4 = scmp.ne.s32.totalorder %s4336_s24, 0 }
  0x54   : > { %s2483_s27 = sshll.u32 %s3500_s23, 7  ;;  %s234_s7 = scalar_lea.sflag [#allocation3], %s3500_s23 }
  0x55   : > { %s3506_s6 = scalar_lea.vmem [#allocation2], %s2483_s27 }
  0x56   : > { %3303 = dma.done.wait (%p4344_p4), %s234_s7, 2048  }
  0x57   : > { %3305 = vsyncadd (%p4344_p4), %s234_s7, 4294965248  ;;  %p4345_p8 = scmp.eq.s32.totalorder %s3394_s22, 0 }
  0x59   : > { %3307 = dma.done.wait (%p4345_p8), [#allocation6], 12288   ;;  %p4346_p7 = pmov %p4345_p8 }
  0x5a   : > { %v275_v0 = vld [vmem:[%s3506_s6] sm:$0xff]  ;;  %v277_v1 = vld [vmem:[%s3506_s6 + $0x10] sm:$0xff]  ;;  %v276_v2 = vld [vmem:[%s3506_s6 + $0x8] sm:$0xff]  ;;  %s4221_s13 = scalar_lea.vmem [#allocation8], %s2483_s27  ;;  %s2655_s14 = sshll.u32 %s3394_s22, 11 }
  0x5b   : > { %3309 = vsyncadd (%p4346_p7), [#allocation6], 4294955008  ;;  %291 = vadd.xlane.f32.xlu0 %v275_v0  ;;  %295 = vadd.xlane.f32.xlu1 %v277_v1  ;;  %v278_v3 = vld [vmem:[%s3506_s6 + $0x18] sm:$0xff]  ;;  %v279_v4 = vld [vmem:[%s3506_s6 + $0x20] sm:$0xff]  ;;  %s2382_s29 = sshll.u32 %s4221_s13, 4  ;;  %s4243_s11 = scalar_lea.hbm %s4294_s5, %s2655_s14  ;;  %s4245_s29 = int_to_ptr.vmem [resolvable:$true] %s2382_s29 }
  0x5c   : > { %v280_v5 = vld [vmem:[%s3506_s6 + $0x28] sm:$0xff]  ;;  %v3523_v6 = vld [vmem:[%s3506_s6 + $0x30] sm:$0xff]  ;;  %v3526_v7 = vld [vmem:[%s3506_s6 + $0x38] sm:$0xff]  ;;  %s2369_s15 = scalar_lea.sflag [#allocation4], %s3500_s23  ;;  %s3260_s16 = scalar_lea.vmem %s4245_s29, 2048 }
  0x5d   : > { %v3529_v8 = vld [vmem:[%s3506_s6 + $0x40] sm:$0xff]  ;;  %v3532_v9 = vld [vmem:[%s3506_s6 + $0x48] sm:$0xff]  ;;  %v3537_v10 = vld [vmem:[%s3506_s6 + $0x50] sm:$0xff]  ;;  %p3261_p11 = scmp.ne.s32.totalorder %s4245_s29, %s3260_s16  ;;  %p4422_p10 = scmp.ne.s32.totalorder %s4341_s30, 0 }
  0x5e   : > { %v3540_v11 = vld [vmem:[%s3506_s6 + $0x58] sm:$0xff]  ;;  %v3545_v12 = vld [vmem:[%s3506_s6 + $0x60] sm:$0xff]  ;;  %v3548_v13 = vld [vmem:[%s3506_s6 + $0x68] sm:$0xff]  ;;  %s3340_s22 = smov [#allocation8]  }
  0x5f   : > { %293 = vadd.xlane.f32.xlu0 %v276_v2  ;;  %297 = vadd.xlane.f32.xlu1 %v278_v3  ;;  %v3553_v14 = vld [vmem:[%s3506_s6 + $0x70] sm:$0xff]  ;;  %v3558_v15 = vld [vmem:[%s3506_s6 + $0x78] sm:$0xff]  ;;  %v578_v16 = vld [vmem:[#allocation5 + $0x1c0] sm:$0xff]  ;;  %p3262_p1 = pnand %p3261_p11, %p4422_p10  ;;  %s3264_s27 = sshll.u32 %s3340_s22, 4  ;;  %s3265_s27 = int_to_ptr.vmem [resolvable:$false] %s3264_s27 }
  0x60   : > { %v582_v17 = vld [vmem:[#allocation5 + $0x1e0] sm:$0xff]  ;;  %v579_v18 = vld [vmem:[#allocation5 + $0x1c8] sm:$0xff]  ;;  %s3266_s7 = scalar_lea.vmem %s3265_s27, 4096  ;;  %p3267_p6 = scmp.lt.s32.totalorder %s4245_s29, %s3265_s27 }
  0x61   : > { %v2546_v19 = vcombine.high %v578_v16, %v582_v17  ;;  %v583_v20 = vld [vmem:[#allocation5 + $0x1e8] sm:$0xff]  ;;  %v2545_v21 = vcombine.low %v578_v16, %v582_v17  ;;  %v570_v56 = vld [vmem:[#allocation5 + $0x180] sm:$0xff]  ;;  %p3263_p2 = pneg %p3262_p1  ;;  %p3268_p12 = scmp.lt.s32.totalorder %s3266_s7, %s3260_s16 }
  0x62   : > { %v2548_v22 = vcombine.high %v579_v18, %v583_v20  ;;  %v2547_v23 = vcombine.low %v579_v18, %v583_v20  ;;  %v574_v57 = vld [vmem:[#allocation5 + $0x1a0] sm:$0xff]  ;;  %v571_v58 = vld [vmem:[#allocation5 + $0x188] sm:$0xff] }
  0x63   : > { %299 = vadd.xlane.f32.xlu0 %v279_v4  ;;  %301 = vadd.xlane.f32.xlu1 %v280_v5  ;;  %v575_v62 = vld [vmem:[#allocation5 + $0x1a8] sm:$0xff]  ;;  %v2538_v63 = vcombine.high %v570_v56, %v574_v57  ;;  %p3269_p3 = por %p3268_p12, %p3267_p6 }
  0x64   : > { %906 = vmatprep.subr.bf16.mxu0 %v2546_v19  ;;  %1019 = vmatprep.subr.bf16.mxu1 %v2548_v22  ;;  %v566_v19 = vld [vmem:[#allocation5 + $0x160] sm:$0xff]  ;;  %v563_v20 = vld [vmem:[#allocation5 + $0x148] sm:$0xff] }
  0x65   : > { %907 = vmatpush1.bf16.msra.mxu0 %v2545_v21  ;;  %1020 = vmatpush1.bf16.msra.mxu1 %v2547_v23  ;;  %v567_v22 = vld [vmem:[#allocation5 + $0x168] sm:$0xff]  ;;  %p3270_p9 = pnand %p3269_p3, %p3263_p2 }
  0x66   : > { %908 = vmatprep.subr.bf16.mxu0 %v2538_v63 }
  0x67   : > { %303 = vadd.xlane.f32.xlu0 %v3523_v6  ;;  %305 = vadd.xlane.f32.xlu1 %v3526_v7 }
  0x6b   : > { %307 = vadd.xlane.f32.xlu0 %v3529_v8  ;;  %309 = vadd.xlane.f32.xlu1 %v3532_v9 }
  0x6f   : > { %311 = vadd.xlane.f32.xlu0 %v3537_v10  ;;  %313 = vadd.xlane.f32.xlu1 %v3540_v11 }
  0x73   : > { %315 = vadd.xlane.f32.xlu0 %v3545_v12  ;;  %317 = vadd.xlane.f32.xlu1 %v3548_v13 }
  0x77   : > { %319 = vadd.xlane.f32.xlu0 %v3553_v14  ;;  %321 = vadd.xlane.f32.xlu1 %v3558_v15 }
  0xe4   : > { %v292_v24 = vpop.xlane.xlu0 %291  ;;  %v296_v25 = vpop.xlane.xlu1 %295 }
  0xe5   : > { %v324_v26 = vmul.f32 0.0078125, %v292_v24  ;;  %v326_v27 = vmul.f32 0.0078125, %v296_v25  ;;  %v2532_v25 = vcombine.high %v563_v20, %v567_v22 }
  0xe7   : > { %v3562_v28 = vsub.f32 %v275_v0, %v324_v26  ;;  %v3564_v29 = vsub.f32 %v277_v1, %v326_v27  ;;  %v2540_v0 = vcombine.high %v571_v58, %v575_v62  ;;  %v2537_v1 = vcombine.low %v570_v56, %v574_v57  ;;  %v547_v56 = vld [vmem:[#allocation5 + $0xc8] sm:$0xff] }
  0xe8   : > { %v294_v30 = vpop.xlane.xlu0 %293  ;;  %v298_v31 = vpop.xlane.xlu1 %297 }
  0xe9   : > { %v325_v32 = vmul.f32 0.0078125, %v294_v30  ;;  %v356_v33 = vmul.f32 %v3562_v28, %v3562_v28  ;;  %v327_v34 = vmul.f32 0.0078125, %v298_v31  ;;  %v358_v37 = vmul.f32 %v3564_v29, %v3564_v29  ;;  %1021 = vmatprep.subr.bf16.mxu1 %v2540_v0  ;;  %909 = vmatpush1.bf16.msra.mxu0 %v2537_v1  ;;  %v538_v1 = vld [vmem:[#allocation5 + $0x80] sm:$0xff] }
  0xea   : > { %v2531_v31 = vcombine.low %v563_v20, %v567_v22 }
  0xeb   : > { %v3568_v35 = vsub.f32 %v276_v2, %v325_v32  ;;  %372 = vadd.xlane.f32.xlu0 %v356_v33  ;;  %v3570_v36 = vsub.f32 %v278_v3, %v327_v34  ;;  %v2539_v2 = vcombine.low %v571_v58, %v575_v62  ;;  %v551_v58 = vld [vmem:[#allocation5 + $0xe8] sm:$0xff] }
  0xec   : > { %v300_v38 = vpop.xlane.xlu0 %299  ;;  %v302_v39 = vpop.xlane.xlu1 %301  ;;  %v2515_v63 = vcombine.low %v547_v56, %v551_v58 }
  0xed   : > { %v328_v40 = vmul.f32 0.0078125, %v300_v38  ;;  %v357_v41 = vmul.f32 %v3568_v35, %v3568_v35  ;;  %v329_v42 = vmul.f32 0.0078125, %v302_v39  ;;  %v359_v45 = vmul.f32 %v3570_v36, %v3570_v36  ;;  %1022 = vmatpush1.bf16.msra.mxu1 %v2539_v2  ;;  %v555_v38 = vld [vmem:[#allocation5 + $0x108] sm:$0xff]  ;;  %v542_v2 = vld [vmem:[#allocation5 + $0xa0] sm:$0xff] }
  0xee   : > { %1023 = vmatprep.subr.bf16.mxu1 %v2532_v25 }
  0xef   : > { %v3576_v43 = vsub.f32 %v279_v4, %v328_v40  ;;  %376 = vadd.xlane.f32.xlu0 %v358_v37  ;;  %374 = vadd.xlane.f32.xlu1 %v357_v41  ;;  %v3578_v44 = vsub.f32 %v280_v5, %v329_v42  ;;  %v554_v37 = vld [vmem:[#allocation5 + $0x100] sm:$0xff]  ;;  %v559_v40 = vld [vmem:[#allocation5 + $0x128] sm:$0xff] }
  0xf0   : > { %v304_v46 = vpop.xlane.xlu0 %303  ;;  %v306_v47 = vpop.xlane.xlu1 %305 }
  0xf1   : > { %v330_v48 = vmul.f32 0.0078125, %v304_v46  ;;  %v360_v49 = vmul.f32 %v3576_v43, %v3576_v43  ;;  %v331_v50 = vmul.f32 0.0078125, %v306_v47  ;;  %v361_v53 = vmul.f32 %v3578_v44, %v3578_v44  ;;  %1024 = vmatpush1.bf16.msra.mxu1 %v2531_v31 }
  0xf3   : > { %v3585_v51 = vsub.f32 %v3523_v6, %v330_v48  ;;  %378 = vadd.xlane.f32.xlu1 %v359_v45  ;;  %380 = vadd.xlane.f32.xlu0 %v360_v49  ;;  %v3588_v52 = vsub.f32 %v3526_v7, %v331_v50  ;;  %v2524_v45 = vcombine.high %v555_v38, %v559_v40 }
  0xf4   : > { %v308_v54 = vpop.xlane.xlu0 %307  ;;  %v310_v55 = vpop.xlane.xlu1 %309  ;;  %v2523_v49 = vcombine.low %v555_v38, %v559_v40  ;;  %v3638_v38 = vld [vmem:[#allocation5 + $0x1d0] sm:$0xff] }
  0xf5   : > { %v332_v59 = vmul.f32 0.0078125, %v308_v54  ;;  %v362_v60 = vmul.f32 %v3585_v51, %v3585_v51  ;;  %v333_v61 = vmul.f32 0.0078125, %v310_v55  ;;  %v363_v5 = vmul.f32 %v3588_v52, %v3588_v52  ;;  %1025 = vmatprep.subr.bf16.mxu1 %v2524_v45  ;;  %v546_v55 = vld [vmem:[#allocation5 + $0xc0] sm:$0xff] }
  0xf6   : > { %1026 = vmatpush1.bf16.msra.mxu1 %v2523_v49 }
  0xf7   : > { %v3595_v3 = vsub.f32 %v3529_v8, %v332_v59  ;;  %382 = vadd.xlane.f32.xlu1 %v361_v53  ;;  %384 = vadd.xlane.f32.xlu0 %v362_v60  ;;  %v3598_v4 = vsub.f32 %v3532_v9, %v333_v61  ;;  %v562_v8 = vld [vmem:[#allocation5 + $0x140] sm:$0xff]  ;;  %v2516_v61 = vcombine.high %v547_v56, %v551_v58 }
  0xf8   : > { %v312_v6 = vpop.xlane.xlu0 %311  ;;  %v314_v7 = vpop.xlane.xlu1 %313  ;;  %v2530_v21 = vcombine.high %v562_v8, %v566_v19  ;;  %v2529_v30 = vcombine.low %v562_v8, %v566_v19  ;;  %v534_v8 = vld [vmem:[#allocation5 + $0x60] sm:$0xff]  ;;  %v531_v19 = vld [vmem:[#allocation5 + $0x48] sm:$0xff] }
  0xf9   : > { %v334_v16 = vmul.f32 0.0078125, %v312_v6  ;;  %v364_v17 = vmul.f32 %v3595_v3, %v3595_v3  ;;  %v335_v18 = vmul.f32 0.0078125, %v314_v7  ;;  %v365_v9 = vmul.f32 %v3598_v4, %v3598_v4  ;;  %1027 = vmatprep.subr.bf16.mxu1 %v2516_v61  ;;  %v543_v7 = vld [vmem:[#allocation5 + $0xa8] sm:$0xff] }
  0xfa   : > { %910 = vmatprep.subr.bf16.mxu0 %v2530_v21  ;;  %1028 = vmatpush1.bf16.msra.mxu1 %v2515_v63  ;;  %v2506_v6 = vcombine.high %v538_v1, %v542_v2 }
  0xfb   : > { %v3607_v23 = vsub.f32 %v3537_v10, %v334_v16  ;;  %386 = vadd.xlane.f32.xlu1 %v363_v5  ;;  %388 = vadd.xlane.f32.xlu0 %v364_v17  ;;  %v3610_v24 = vsub.f32 %v3540_v11, %v335_v18  ;;  %v558_v10 = vld [vmem:[#allocation5 + $0x120] sm:$0xff]  ;;  %v539_v5 = vld [vmem:[#allocation5 + $0x88] sm:$0xff]  ;;  %v2505_v16 = vcombine.low %v538_v1, %v542_v2 }
  0xfc   : > { %v316_v26 = vpop.xlane.xlu0 %315  ;;  %v318_v27 = vpop.xlane.xlu1 %317  ;;  %911 = vmatpush1.bf16.msra.mxu0 %v2529_v30  ;;  %v2522_v11 = vcombine.high %v554_v37, %v558_v10  ;;  %v2521_v48 = vcombine.low %v554_v37, %v558_v10  ;;  %v2507_v17 = vcombine.low %v539_v5, %v543_v7  ;;  %v530_v18 = vld [vmem:[#allocation5 + $0x40] sm:$0xff]  ;;  %v523_v30 = vld [vmem:[#allocation5 + $0x8] sm:$0xff]  ;;  %v3339_v10 = vmov 0  }
  0xfd   : > { %v336_v32 = vmul.f32 0.0078125, %v316_v26  ;;  %v366_v33 = vmul.f32 %v3607_v23, %v3607_v23  ;;  %v337_v34 = vmul.f32 0.0078125, %v318_v27  ;;  %v367_v39 = vmul.f32 %v3610_v24, %v3610_v24  ;;  %v522_v26 = vld [vmem:[#allocation5] sm:$0xff]  ;;  %938 = vmatprep.mubr.bf16.mxu0 %v3339_v10  ;;  %1051 = vmatprep.mubr.bf16.mxu1 %v3339_v10 }
  0xfe   : > { %912 = vmatprep.subr.bf16.mxu0 %v2522_v11  ;;  %v2498_v20 = vcombine.high %v530_v18, %v534_v8  ;;  %v2497_v22 = vcombine.low %v530_v18, %v534_v8  ;;  %v526_v27 = vld [vmem:[#allocation5 + $0x20] sm:$0xff]  ;;  %v3642_v11 = vld [vmem:[#allocation5 + $0x1d8] sm:$0xff] }
  0xff   : > { %v3617_v41 = vsub.f32 %v3545_v12, %v336_v32  ;;  %390 = vadd.xlane.f32.xlu1 %v365_v9  ;;  %392 = vadd.xlane.f32.xlu0 %v366_v33  ;;  %v3620_v42 = vsub.f32 %v3548_v13, %v337_v34  ;;  %v550_v12 = vld [vmem:[#allocation5 + $0xe0] sm:$0xff]  ;;  %v535_v9 = vld [vmem:[#allocation5 + $0x68] sm:$0xff]  ;;  %v2490_v31 = vcombine.high %v522_v26, %v526_v27 }
 0x100   : > { %v320_v46 = vpop.xlane.xlu0 %319  ;;  %v322_v47 = vpop.xlane.xlu1 %321  ;;  %913 = vmatpush1.bf16.msra.mxu0 %v2521_v48  ;;  %v2514_v13 = vcombine.high %v546_v55, %v550_v12  ;;  %v2513_v62 = vcombine.low %v546_v55, %v550_v12  ;;  %v2500_v21 = vcombine.high %v531_v19, %v535_v9  ;;  %v2499_v25 = vcombine.low %v531_v19, %v535_v9  ;;  %v527_v32 = vld [vmem:[#allocation5 + $0x28] sm:$0xff]  ;;  %v3658_v8 = vld [vmem:[%s4290_s1] ss:$0 sm:$0xff] }
 0x101   : > { %v338_v50 = vmul.f32 0.0078125, %v320_v46  ;;  %v368_v53 = vmul.f32 %v3617_v41, %v3617_v41  ;;  %v339_v54 = vmul.f32 0.0078125, %v322_v47  ;;  %v369_v57 = vmul.f32 %v3620_v42, %v3620_v42  ;;  %v3648_v46 = vld [vmem:[#allocation5 + $0x1f8] sm:$0xff] }
 0x102   : > { %914 = vmatprep.subr.bf16.mxu0 %v2514_v13  ;;  %v2492_v33 = vcombine.high %v523_v30, %v527_v32  ;;  %v2489_v34 = vcombine.low %v522_v26, %v526_v27  ;;  %v2491_v37 = vcombine.low %v523_v30, %v527_v32  ;;  %v2551_v47 = vcombine.low %v3642_v11, %v3648_v46  ;;  %v3665_v30 = vld [vmem:[%s4291_s2] ss:$0 sm:$0xff] }
 0x103   : > { %v3627_v59 = vsub.f32 %v3553_v14, %v338_v50  ;;  %394 = vadd.xlane.f32.xlu1 %v367_v39  ;;  %396 = vadd.xlane.f32.xlu0 %v368_v53  ;;  %v3630_v60 = vsub.f32 %v3558_v15, %v339_v54  ;;  %v2508_v15 = vcombine.high %v539_v5, %v543_v7  ;;  %v3640_v39 = vld [vmem:[#allocation5 + $0x1f0] sm:$0xff] }
 0x104   : > { %915 = vmatpush1.bf16.msra.mxu0 %v2513_v62  ;;  %v2549_v40 = vcombine.low %v3638_v38, %v3640_v39  ;;  %v2550_v45 = vcombine.high %v3638_v38, %v3640_v39  ;;  %v2552_v48 = vcombine.high %v3642_v11, %v3648_v46  ;;  %v556_v11 = vld [vmem:[#allocation5 + $0x110] sm:$0xff] }
 0x105   : > { %v370_v0 = vmul.f32 %v3627_v59, %v3627_v59  ;;  %v371_v14 = vmul.f32 %v3630_v60, %v3630_v60  ;;  %916 = vmatprep.subr.bf16.mxu0 %v2506_v6  ;;  %1029 = vmatprep.subr.bf16.mxu1 %v2508_v15 }
 0x106   : > { %1030 = vmatpush1.bf16.msra.mxu1 %v2507_v17 }
 0x107   : > { %398 = vadd.xlane.f32.xlu1 %v369_v57  ;;  %400 = vadd.xlane.f32.xlu0 %v370_v0 }
 0x108   : > { %917 = vmatpush1.bf16.msra.mxu0 %v2505_v16  ;;  %1031 = vmatprep.subr.bf16.mxu1 %v2500_v21 }
 0x109   : > { %918 = vmatprep.subr.bf16.mxu0 %v2498_v20 }
 0x10a   : > { %1032 = vmatpush1.bf16.msra.mxu1 %v2499_v25 }
 0x10b   : > { %402 = vadd.xlane.f32.xlu1 %v371_v14  ;;  %1033 = vmatprep.subr.bf16.mxu1 %v2492_v33 }
 0x10c   : > { %919 = vmatpush1.bf16.msra.mxu0 %v2497_v22 }
 0x10d   : > { %920 = vmatprep.subr.bf16.mxu0 %v2490_v31 }
 0x10e   : > { %1034 = vmatpush1.bf16.msra.mxu1 %v2491_v37 }
 0x10f   : > { %1245 = vmatprep.subr.bf16.mxu1 %v2552_v48  ;;  %v573_v48 = vld [vmem:[#allocation5 + $0x198] sm:$0xff] }
 0x110   : > { %921 = vmatpush1.bf16.msra.mxu0 %v2489_v34  ;;  %v572_v34 = vld [vmem:[#allocation5 + $0x190] sm:$0xff] }
 0x111   : > { %1132 = vmatprep.subr.bf16.mxu0 %v2550_v45  ;;  %v576_v45 = vld [vmem:[#allocation5 + $0x1b0] sm:$0xff] }
 0x174   : > { %v373_v49 = vpop.xlane.xlu0 %372 }
 0x175   : > { %v404_v50 = vmul.f32 0.0078125, %v373_v49  ;;  %v577_v49 = vld [vmem:[#allocation5 + $0x1b8] sm:$0xff] }
 0x177   : > { %v420_v53 = vadd.f32 1e-05, %v404_v50 }
 0x178   : > { %v375_v54 = vpop.xlane.xlu1 %374  ;;  %v377_v55 = vpop.xlane.xlu0 %376 }
 0x179   : > { %2892 = vrsqrt.f32 %v420_v53  ;;  %v405_v12 = vmul.f32 0.0078125, %v375_v54  ;;  %v406_v56 = vmul.f32 0.0078125, %v377_v55  ;;  %v3672_v54 = vld [vmem:[#allocation5 + $0x150] sm:$0xff] }
 0x17b   : > { %v421_v57 = vadd.f32 1e-05, %v405_v12  ;;  %v422_v13 = vadd.f32 1e-05, %v406_v56  ;;  %v3676_v56 = vld [vmem:[#allocation5 + $0x170] sm:$0xff] }
 0x17c   : > { %v379_v58 = vpop.xlane.xlu1 %378  ;;  %v381_v61 = vpop.xlane.xlu0 %380 }
 0x17d   : > { %2894 = vrsqrt.f32 %v421_v57  ;;  %v407_v62 = vmul.f32 0.0078125, %v379_v58  ;;  %v408_v0 = vmul.f32 0.0078125, %v381_v61  ;;  %v3678_v57 = vld [vmem:[#allocation5 + $0x158] sm:$0xff] }
 0x17e   : > { %2896 = vrsqrt.f32 %v422_v13  ;;  %v3680_v13 = vld [vmem:[#allocation5 + $0x178] sm:$0xff] }
 0x17f   : > { %v423_v63 = vadd.f32 1e-05, %v407_v62  ;;  %v424_v5 = vadd.f32 1e-05, %v408_v0  ;;  %v2542_v62 = vcombine.high %v572_v34, %v576_v45 }
 0x180   : > { %v383_v1 = vpop.xlane.xlu1 %382  ;;  %v385_v6 = vpop.xlane.xlu0 %384 }
 0x181   : > { %2898 = vrsqrt.f32 %v423_v63  ;;  %v409_v2 = vmul.f32 0.0078125, %v383_v1  ;;  %v410_v17 = vmul.f32 0.0078125, %v385_v6  ;;  %v2544_v63 = vcombine.high %v573_v48, %v577_v49 }
 0x182   : > { %v2534_v6 = vcombine.high %v3672_v54, %v3676_v56 }
 0x183   : > { %v425_v14 = vadd.f32 1e-05, %v409_v2  ;;  %v426_v9 = vadd.f32 1e-05, %v410_v17  ;;  %v557_v17 = vld [vmem:[#allocation5 + $0x118] sm:$0xff] }
 0x184   : > { %v387_v7 = vpop.xlane.xlu1 %386  ;;  %v389_v22 = vpop.xlane.xlu0 %388 }
 0x185   : > { %2900 = vrsqrt.f32 %v425_v14  ;;  %v411_v15 = vmul.f32 0.0078125, %v387_v7  ;;  %v412_v33 = vmul.f32 0.0078125, %v389_v22  ;;  %v2543_v14 = vcombine.low %v573_v48, %v577_v49 }
 0x186   : > { %v2893_v16 = vpop.eup %2892  ;;  %2902 = vrsqrt.f32 %v424_v5  ;;  %v2536_v7 = vcombine.high %v3678_v57, %v3680_v13 }
 0x187   : > { %v452_v18 = vmul.f32 %v2893_v16, %v3562_v28  ;;  %v427_v19 = vadd.f32 1e-05, %v411_v15  ;;  %v560_v16 = vld [vmem:[#allocation5 + $0x130] sm:$0xff] }
 0x188   : > { %v391_v21 = vpop.xlane.xlu1 %390  ;;  %v393_v5 = vpop.xlane.xlu0 %392 }
 0x189   : > { %v475_v26 = vmul.f32 %v3658_v8, %v452_v18  ;;  %2904 = vrsqrt.f32 %v427_v19  ;;  %v413_v28 = vmul.f32 0.0078125, %v391_v21  ;;  %v561_v18 = vld [vmem:[#allocation5 + $0x138] sm:$0xff]  ;;  %v2533_v19 = vcombine.low %v3672_v54, %v3676_v56  ;;  %v540_v56 = vld [vmem:[#allocation5 + $0x90] sm:$0xff] }
 0x18a   : > { %v2895_v20 = vpop.eup %2894  ;;  %2906 = vrsqrt.f32 %v426_v9  ;;  %v2527_v48 = vcombine.low %v557_v17, %v561_v18 }
 0x18b   : > { %v453_v25 = vmul.f32 %v2895_v20, %v3568_v35  ;;  %v2897_v27 = vpop.eup %2896  ;;  %v498_v37 = vadd.f32 %v3665_v30, %v475_v26  ;;  %v429_v55 = vadd.f32 1e-05, %v413_v28  ;;  %v2528_v26 = vcombine.high %v557_v17, %v561_v18 }
 0x18c   : > { %v454_v50 = vmul.f32 %v2897_v27, %v3564_v29  ;;  %v395_v61 = vpop.xlane.xlu1 %394  ;;  %v428_v29 = vadd.f32 1e-05, %v412_v33  ;;  %v3709_v27 = vld [vmem:[#allocation5 + $0xd0] sm:$0xff] }
 0x18d   : > { %v476_v31 = vmul.f32 %v3658_v8, %v453_v25  ;;  %2908 = vrsqrt.f32 %v429_v55  ;;  %v415_v15 = vmul.f32 0.0078125, %v395_v61  ;;  %v2526_v25 = vcombine.high %v556_v11, %v560_v16  ;;  %v552_v33 = vld [vmem:[#allocation5 + $0xf0] sm:$0xff] }
 0x18e   : > { %v2899_v32 = vpop.eup %2898  ;;  %v477_v1 = vmul.f32 %v3658_v8, %v454_v50  ;;  %2910 = vrsqrt.f32 %v428_v29  ;;  %v2518_v54 = vcombine.high %v3709_v27, %v552_v33  ;;  %v544_v61 = vld [vmem:[#allocation5 + $0xb0] sm:$0xff] }
 0x18f   : > { %v499_v35 = vadd.f32 %v3665_v30, %v476_v31  ;;  %v455_v53 = vmul.f32 %v2899_v32, %v3570_v36  ;;  %v2541_v36 = vcombine.low %v572_v34, %v576_v45  ;;  %v431_v20 = vadd.f32 1e-05, %v415_v15  ;;  %v549_v34 = vld [vmem:[#allocation5 + $0xd8] sm:$0xff] }
 0x190   : > { %v500_v46 = vadd.f32 %v3665_v30, %v477_v1  ;;  %v2525_v45 = vcombine.low %v556_v11, %v560_v16  ;;  %v537_v11 = vld [vmem:[#allocation5 + $0x78] sm:$0xff] }
 0x191   : > { %v3674_v12 = vpack.c.bf16 %v499_v35, %v498_v37  ;;  %v478_v0 = vmul.f32 %v3658_v8, %v455_v53  ;;  %v553_v37 = vld [vmem:[#allocation5 + $0xf8] sm:$0xff]  ;;  %v397_v35 = vpop.xlane.xlu0 %396  ;;  %2912 = vrsqrt.f32 %v431_v20 }
 0x192   : > { %v2901_v58 = vpop.eup %2900  ;;  %v2520_v55 = vcombine.high %v549_v34, %v553_v37  ;;  %v2519_v1 = vcombine.low %v549_v34, %v553_v37 }
 0x193   : > { %939 = vmatmul.mubr.bf16.vlgmr.msra.gmra.mxu0 %v3674_v12  ;;  %1052 = vmatmul.mubr.bf16.vlgmr.msra.gmra.mxu1 %v3674_v12  ;;  %v2903_v2 = vpop.eup %2902  ;;  %v501_v38 = vadd.f32 %v3665_v30, %v478_v0  ;;  %v457_v39 = vmul.f32 %v2901_v58, %v3578_v44  ;;  %v2535_v44 = vcombine.low %v3678_v57, %v3680_v13  ;;  %v416_v57 = vmul.f32 0.0078125, %v397_v35 }
 0x194   : > { %1133 = vmatpush1.bf16.msra.mxu0 %v2549_v40  ;;  %1246 = vmatpush1.bf16.msra.mxu1 %v2551_v47  ;;  %v414_v40 = vmul.f32 0.0078125, %v393_v5  ;;  %v456_v47 = vmul.f32 %v2903_v2, %v3576_v43  ;;  %v399_v43 = vpop.xlane.xlu1 %398  ;;  %v2517_v0 = vcombine.low %v3709_v27, %v552_v33  ;;  %v525_v27 = vld [vmem:[#allocation5 + $0x18] sm:$0xff] }
 0x195   : > { %948 = vmatprep.mubr.bf16.mxu0 %v3339_v10  ;;  %1061 = vmatprep.mubr.bf16.mxu1 %v3339_v10  ;;  %v3704_v9 = vpack.c.bf16 %v501_v38, %v500_v46  ;;  %v480_v21 = vmul.f32 %v3658_v8, %v457_v39  ;;  %v417_v49 = vmul.f32 0.0078125, %v399_v43  ;;  %v536_v38 = vld [vmem:[#allocation5 + $0x70] sm:$0xff]  ;;  %v533_v39 = vld [vmem:[#allocation5 + $0x58] sm:$0xff]  ;;  %v401_v46 = vpop.xlane.xlu0 %400 }
 0x196   : > { %1134 = vmatprep.subr.bf16.mxu0 %v2542_v62  ;;  %1247 = vmatprep.subr.bf16.mxu1 %v2544_v63  ;;  %v2905_v22 = vpop.eup %2904  ;;  %v430_v31 = vadd.f32 1e-05, %v414_v40  ;;  %v479_v32 = vmul.f32 %v3658_v8, %v456_v47  ;;  %v541_v62 = vld [vmem:[#allocation5 + $0x98] sm:$0xff]  ;;  %v2509_v47 = vcombine.low %v540_v56, %v544_v61  ;;  %v2503_v34 = vcombine.low %v533_v39, %v537_v11 }
 0x197   : > { %v2907_v28 = vpop.eup %2906  ;;  %v503_v50 = vadd.f32 %v3665_v30, %v480_v21  ;;  %v459_v53 = vmul.f32 %v2905_v22, %v3588_v52  ;;  %v545_v63 = vld [vmem:[#allocation5 + $0xb8] sm:$0xff]  ;;  %v433_v29 = vadd.f32 1e-05, %v417_v49  ;;  %v524_v21 = vld [vmem:[#allocation5 + $0x10] sm:$0xff]  ;;  %v418_v22 = vmul.f32 0.0078125, %v401_v46 }
 0x198   : > { %1135 = vmatpush1.bf16.msra.mxu0 %v2541_v36  ;;  %1248 = vmatpush1.bf16.msra.mxu1 %v2543_v14  ;;  %2914 = vrsqrt.f32 %v430_v31  ;;  %v502_v13 = vadd.f32 %v3665_v30, %v479_v32  ;;  %v458_v58 = vmul.f32 %v2907_v28, %v3585_v51  ;;  %v403_v5 = vpop.xlane.xlu1 %402  ;;  %v2510_v14 = vcombine.high %v540_v56, %v544_v61  ;;  %v532_v51 = vld [vmem:[#allocation5 + $0x50] sm:$0xff]  ;;  %v529_v28 = vld [vmem:[#allocation5 + $0x38] sm:$0xff] }
 0x199   : > { %1136 = vmatprep.subr.bf16.mxu0 %v2534_v6  ;;  %1249 = vmatprep.subr.bf16.mxu1 %v2536_v7  ;;  %v482_v52 = vmul.f32 %v3658_v8, %v459_v53  ;;  %v2512_v6 = vcombine.high %v541_v62, %v545_v63  ;;  %v432_v7 = vadd.f32 1e-05, %v416_v57  ;;  %v2511_v16 = vcombine.low %v541_v62, %v545_v63  ;;  %v2867_v46 = vld [vmem:[#allocation7 + $0xb0] sm:$0xff]  }
 0x19a   : > { %v3722_v36 = vpack.c.bf16 %v503_v50, %v502_v13  ;;  %v2909_v2 = vpop.eup %2908  ;;  %v481_v15 = vmul.f32 %v3658_v8, %v458_v58  ;;  %2916 = vrsqrt.f32 %v433_v29  ;;  %v419_v17 = vmul.f32 0.0078125, %v403_v5 }
 0x19b   : > { %949 = vmatmul.mubr.bf16.gmra.mxu0 %v3704_v9  ;;  %1062 = vmatmul.mubr.bf16.gmra.mxu1 %v3704_v9  ;;  %v2911_v40 = vpop.eup %2910  ;;  %v505_v18 = vadd.f32 %v3665_v30, %v482_v52  ;;  %v2502_v20 = vcombine.high %v532_v51, %v536_v38  ;;  %2918 = vrsqrt.f32 %v432_v7  ;;  %v2501_v31 = vcombine.low %v532_v51, %v536_v38 }
 0x19c   : > { %958 = vmatprep.mubr.bf16.mxu0 %v3339_v10  ;;  %1071 = vmatprep.mubr.bf16.mxu1 %v3339_v10  ;;  %v504_v43 = vadd.f32 %v3665_v30, %v481_v15  ;;  %v435_v32 = vadd.f32 1e-05, %v419_v17  ;;  %v2870_v17 = vld [vmem:[#allocation7 + $0x28] sm:$0xff]  }
 0x19d   : > { %1137 = vmatpush1.bf16.msra.mxu0 %v2533_v19  ;;  %1250 = vmatpush1.bf16.msra.mxu1 %v2535_v44  ;;  %v461_v19 = vmul.f32 %v2909_v2, %v3598_v4  ;;  %v2504_v44 = vcombine.high %v533_v39, %v537_v11 }
 0x19e   : > { %1138 = vmatprep.subr.bf16.mxu0 %v2526_v25  ;;  %1251 = vmatprep.subr.bf16.mxu1 %v2528_v26  ;;  %v460_v25 = vmul.f32 %v2911_v40, %v3595_v3  ;;  %v528_v26 = vld [vmem:[#allocation5 + $0x30] sm:$0xff]  ;;  %v3734_v33 = vpack.c.bf16 %v505_v18, %v504_v43  ;;  %v2913_v37 = vpop.eup %2912  ;;  %2920 = vrsqrt.f32 %v435_v32  ;;  %v2871_v18 = vld [vmem:[#allocation7 + $0xa8] sm:$0xff]   ;;  %v2878_v43 = vld [vmem:[#allocation7 + $0x18] sm:$0xff]  }
 0x19f   : > { %v484_v4 = vmul.f32 %v3658_v8, %v461_v19  ;;  %v2494_v35 = vcombine.high %v524_v21, %v528_v26  ;;  %v2493_v50 = vcombine.low %v524_v21, %v528_v26  ;;  %v2866_v40 = vld [vmem:[#allocation7 + $0x30] sm:$0xff]   ;;  %v2872_v19 = vld [vmem:[#allocation7 + $0x60] sm:$0xff]   ;;  %v2876_v21 = vld [vmem:[#allocation7 + $0x58] sm:$0xff]  }
 0x1a0   : > { %v483_v3 = vmul.f32 %v3658_v8, %v460_v25  ;;  %v2879_v25 = vld [vmem:[#allocation7 + $0x98] sm:$0xff]   ;;  %v2880_v26 = vld [vmem:[#allocation7 + $0x50] sm:$0xff]   ;;  %v2884_v32 = vld [vmem:[#allocation7 + $0x48] sm:$0xff]  }
 0x1a1   : > { %1139 = vmatpush1.bf16.msra.mxu0 %v2525_v45  ;;  %1252 = vmatpush1.bf16.msra.mxu1 %v2527_v48  ;;  %v2496_v45 = vcombine.high %v525_v27, %v529_v28  ;;  %v434_v48 = vadd.f32 1e-05, %v418_v22  ;;  %v507_v53 = vadd.f32 %v3665_v30, %v484_v4  ;;  %v2877_v22 = vld [vmem:[#allocation7 + $0xd8] sm:$0xff]   ;;  %v2886_v4 = vld [vmem:[#allocation7 + $0x8] sm:$0xff]  }
 0x1a2   : > { %1140 = vmatprep.subr.bf16.mxu0 %v2518_v54  ;;  %1253 = vmatprep.subr.bf16.mxu1 %v2520_v55  ;;  %v463_v54 = vmul.f32 %v2913_v37, %v3610_v24  ;;  %v2495_v55 = vcombine.low %v525_v27, %v529_v28  ;;  %v506_v56 = vadd.f32 %v3665_v30, %v483_v3  ;;  %v2881_v27 = vld [vmem:[#allocation7 + $0xd0] sm:$0xff]   ;;  %v2888_v37 = vld [vmem:[#allocation7 + $0x40] sm:$0xff]  }
 0x1a3   : > { %959 = vmatmul.mubr.bf16.gmra.mxu0 %v3722_v36  ;;  %1072 = vmatmul.mubr.bf16.gmra.mxu1 %v3722_v36  ;;  %2922 = vrsqrt.f32 %v434_v48  ;;  %v2882_v28 = vld [vmem:[#allocation7 + $0x10] sm:$0xff]   ;;  %v2891_v48 = vld [vmem:[#allocation7 + $0x80] sm:$0xff]  }
 0x1a4   : > { %968 = vmatprep.mubr.bf16.mxu0 %v3339_v10  ;;  %1081 = vmatprep.mubr.bf16.mxu1 %v3339_v10  ;;  %v518_v13 = vpack.c.bf16 %v507_v53, %v506_v56  ;;  %v486_v58 = vmul.f32 %v3658_v8, %v463_v54 }
 0x1a5   : > { %1141 = vmatpush1.bf16.msra.mxu0 %v2517_v0  ;;  %1254 = vmatpush1.bf16.msra.mxu1 %v2519_v1  ;;  %v2915_v49 = vpop.eup %2914 }
 0x1a6   : > { %1142 = vmatprep.subr.bf16.mxu0 %v2510_v14  ;;  %1255 = vmatprep.subr.bf16.mxu1 %v2512_v6  ;;  %v462_v57 = vmul.f32 %v2915_v49, %v3607_v23  ;;  %v509_v63 = vadd.f32 %v3665_v30, %v486_v58 }
 0x1a7   : > { %v2917_v61 = vpop.eup %2916 }
 0x1a8   : > { %v485_v24 = vmul.f32 %v3658_v8, %v462_v57  ;;  %v2919_v62 = vpop.eup %2918  ;;  %v465_v0 = vmul.f32 %v2917_v61, %v3620_v42 }
 0x1a9   : > { %1143 = vmatpush1.bf16.msra.mxu0 %v2509_v47  ;;  %1256 = vmatpush1.bf16.msra.mxu1 %v2511_v16  ;;  %v464_v29 = vmul.f32 %v2919_v62, %v3617_v41  ;;  %v2868_v47 = vld [vmem:[#allocation7 + $0x68] sm:$0xff]  }
 0x1aa   : > { %1144 = vmatprep.subr.bf16.mxu0 %v2502_v20  ;;  %1257 = vmatprep.subr.bf16.mxu1 %v2504_v44  ;;  %v508_v23 = vadd.f32 %v3665_v30, %v485_v24  ;;  %v488_v1 = vmul.f32 %v3658_v8, %v465_v0  ;;  %v2869_v16 = vld [vmem:[#allocation7 + $0xe8] sm:$0xff]   ;;  %v2874_v20 = vld [vmem:[#allocation7 + $0x20] sm:$0xff]  }
 0x1ab   : > { %969 = vmatmul.mubr.bf16.gmra.mxu0 %v3734_v33  ;;  %1082 = vmatmul.mubr.bf16.gmra.mxu1 %v3734_v33  ;;  %v2921_v2 = vpop.eup %2920  ;;  %v487_v5 = vmul.f32 %v3658_v8, %v464_v29  ;;  %v2875_v44 = vld [vmem:[#allocation7 + $0xa0] sm:$0xff]  }
 0x1ac   : > { %978 = vmatprep.mubr.bf16.mxu0 %v3339_v10  ;;  %1091 = vmatprep.mubr.bf16.mxu1 %v3339_v10  ;;  %v519_v52 = vpack.c.bf16 %v509_v63, %v508_v23  ;;  %v511_v6 = vadd.f32 %v3665_v30, %v488_v1  ;;  %v467_v42 = vmul.f32 %v2921_v2, %v3630_v60 }
 0x1ad   : > { %1145 = vmatpush1.bf16.msra.mxu0 %v2501_v31  ;;  %1258 = vmatpush1.bf16.msra.mxu1 %v2503_v34  ;;  %v510_v51 = vadd.f32 %v3665_v30, %v487_v5  ;;  %v2883_v31 = vld [vmem:[#allocation7 + $0x90] sm:$0xff]   ;;  %v2887_v34 = vld [vmem:[#allocation7 + $0x88] sm:$0xff]  }
 0x1ae   : > { %1146 = vmatprep.subr.bf16.mxu0 %v2494_v35  ;;  %1259 = vmatprep.subr.bf16.mxu1 %v2496_v45  ;;  %v490_v15 = vmul.f32 %v3658_v8, %v467_v42  ;;  %v2889_v35 = vld [vmem:[#allocation7 + $0xc0] sm:$0xff]  }
 0x1af   : > { %v520_v7 = vpack.c.bf16 %v511_v6, %v510_v51  ;;  %v2890_v45 = vld [vmem:[#allocation7] sm:$0xff]  }
 0x1b0   : > { %v2923_v14 = vpop.eup %2922  ;;  %v513_v39 = vadd.f32 %v3665_v30, %v490_v15 }
 0x1b1   : > { %1147 = vmatpush1.bf16.msra.mxu0 %v2493_v50  ;;  %1260 = vmatpush1.bf16.msra.mxu1 %v2495_v55  ;;  %v466_v41 = vmul.f32 %v2923_v14, %v3627_v59  ;;  %v2860_v59 = vld [vmem:[#allocation7 + $0x78] sm:$0xff]  }
 0x1b2   : > { %2656 = vmatprep.subr.bf16.mxu0 %v2860_v59 }
 0x1b3   : > { %979 = vmatmul.mubr.bf16.gmra.mxu0 %v518_v13  ;;  %1092 = vmatmul.mubr.bf16.gmra.mxu1 %v518_v13  ;;  %v489_v38 = vmul.f32 %v3658_v8, %v466_v41  ;;  %v2861_v8 = vld [vmem:[#allocation7 + $0xf8] sm:$0xff]  }
 0x1b4   : > { %988 = vmatprep.mubr.bf16.mxu0 %v3339_v10  ;;  %1101 = vmatprep.mubr.bf16.mxu1 %v3339_v10 }
 0x1b5   : > { %v512_v11 = vadd.f32 %v3665_v30, %v489_v38  ;;  %v2862_v30 = vld [vmem:[#allocation7 + $0x38] sm:$0xff]   ;;  %2720 = vmatprep.subr.bf16.mxu1 %v2861_v8 }
 0x1b7   : > { %v521_v60 = vpack.c.bf16 %v513_v39, %v512_v11 }
 0x1bb   : > { %989 = vmatmul.mubr.bf16.gmra.mxu0 %v519_v52  ;;  %1102 = vmatmul.mubr.bf16.gmra.mxu1 %v519_v52 }
 0x1bc   : > { %998 = vmatprep.mubr.bf16.mxu0 %v3339_v10  ;;  %1111 = vmatprep.mubr.bf16.mxu1 %v3339_v10 }
 0x1c3   : > { %999 = vmatmul.mubr.bf16.gmra.mxu0 %v520_v7  ;;  %1112 = vmatmul.mubr.bf16.gmra.mxu1 %v520_v7 }
 0x1c4   : > { %1008 = vmatprep.mubr.bf16.mxu0 %v3339_v10  ;;  %1121 = vmatprep.mubr.bf16.mxu1 %v3339_v10 }
 0x1cb   : > { %1009 = vmatmul.mubr.bf16.gmra.mxu0 %v521_v60  ;;  %1122 = vmatmul.mubr.bf16.gmra.mxu1 %v521_v60 }
 0x1cc   : > { %1164 = vmatprep.mubr.bf16.mxu0 %v3339_v10  ;;  %1277 = vmatprep.mubr.bf16.mxu1 %v3339_v10 }
 0x1d3   : > { %1165 = vmatmul.mubr.bf16.vlgmr.msra.gmra.mxu0 %v3674_v12  ;;  %1278 = vmatmul.mubr.bf16.vlgmr.msra.gmra.mxu1 %v3674_v12  ;;  %v2863_v12 = vld [vmem:[#allocation7 + $0xb8] sm:$0xff]  }
 0x1d4   : > { %1174 = vmatprep.mubr.bf16.mxu0 %v3339_v10  ;;  %1287 = vmatprep.mubr.bf16.mxu1 %v3339_v10 }
 0x1d5   : > { %2657 = vmatpush3.bf16.msra.mxu0 %v2862_v30  ;;  %2721 = vmatpush3.bf16.msra.mxu1 %v2863_v12 }
 0x1db   : > { %1175 = vmatmul.mubr.bf16.gmra.mxu0 %v3704_v9  ;;  %1288 = vmatmul.mubr.bf16.gmra.mxu1 %v3704_v9  ;;  %v2864_v9 = vld [vmem:[#allocation7 + $0x70] sm:$0xff]  }
 0x1dc   : > { %1184 = vmatprep.mubr.bf16.mxu0 %v3339_v10  ;;  %1297 = vmatprep.mubr.bf16.mxu1 %v3339_v10 }
 0x1dd   : > { %2658 = vmatprep.subr.bf16.mxu0 %v2864_v9 }
 0x1de   : > { %2659 = vmatpush3.bf16.msra.mxu0 %v2866_v40 }
 0x1df   : > { %2660 = vmatprep.subr.bf16.mxu0 %v2868_v47 }
 0x1e2   : > { %2661 = vmatpush3.bf16.msra.mxu0 %v2870_v17 }
 0x1e3   : > { %1185 = vmatmul.mubr.bf16.gmra.mxu0 %v3722_v36  ;;  %1298 = vmatmul.mubr.bf16.gmra.mxu1 %v3722_v36  ;;  %v2865_v36 = vld [vmem:[#allocation7 + $0xf0] sm:$0xff]  }
 0x1e4   : > { %1194 = vmatprep.mubr.bf16.mxu0 %v3339_v10  ;;  %1307 = vmatprep.mubr.bf16.mxu1 %v3339_v10 }
 0x1e5   : > { %2722 = vmatprep.subr.bf16.mxu1 %v2865_v36  ;;  %2662 = vmatprep.subr.bf16.mxu0 %v2872_v19 }
 0x1e6   : > { %2723 = vmatpush3.bf16.msra.mxu1 %v2867_v46  ;;  %2663 = vmatpush3.bf16.msra.mxu0 %v2874_v20 }
 0x1e7   : > { %2724 = vmatprep.subr.bf16.mxu1 %v2869_v16  ;;  %2664 = vmatprep.subr.bf16.mxu0 %v2876_v21 }
 0x1ea   : > { %2725 = vmatpush3.bf16.msra.mxu1 %v2871_v18  ;;  %2665 = vmatpush3.bf16.msra.mxu0 %v2878_v43 }
 0x1eb   : > { %1195 = vmatmul.mubr.bf16.gmra.mxu0 %v3734_v33  ;;  %1308 = vmatmul.mubr.bf16.gmra.mxu1 %v3734_v33  ;;  %v2885_v33 = vld [vmem:[#allocation7 + $0xc8] sm:$0xff]  }
 0x1ec   : > { %1204 = vmatprep.mubr.bf16.mxu0 %v3339_v10  ;;  %1317 = vmatprep.mubr.bf16.mxu1 %v3339_v10 }
 0x1ed   : > { %2666 = vmatprep.subr.bf16.mxu0 %v2880_v26 }
 0x1ee   : > { %2667 = vmatpush3.bf16.msra.mxu0 %v2882_v28 }
 0x1ef   : > { %2668 = vmatprep.subr.bf16.mxu0 %v2884_v32 }
 0x1f2   : > { %2669 = vmatpush3.bf16.msra.mxu0 %v2886_v4 }
 0x1f3   : > { %1205 = vmatmul.mubr.bf16.gmra.mxu0 %v518_v13  ;;  %1318 = vmatmul.mubr.bf16.gmra.mxu1 %v518_v13 }
 0x1f4   : > { %1214 = vmatprep.mubr.bf16.mxu0 %v3339_v10  ;;  %1327 = vmatprep.mubr.bf16.mxu1 %v3339_v10 }
 0x1f5   : > { %2670 = vmatprep.subr.bf16.mxu0 %v2888_v37 }
 0x1f6   : > { %2671 = vmatpush3.bf16.msra.mxu0 %v2890_v45 }
 0x1fb   : > { %1215 = vmatmul.mubr.bf16.gmra.mxu0 %v519_v52  ;;  %1328 = vmatmul.mubr.bf16.gmra.mxu1 %v519_v52 }
 0x1fc   : > { %1224 = vmatprep.mubr.bf16.mxu0 %v3339_v10  ;;  %1337 = vmatprep.mubr.bf16.mxu1 %v3339_v10 }
 0x203   : > { %1225 = vmatmul.mubr.bf16.gmra.mxu0 %v520_v7  ;;  %1338 = vmatmul.mubr.bf16.gmra.mxu1 %v520_v7 }
 0x204   : > { %1234 = vmatprep.mubr.bf16.mxu0 %v3339_v10  ;;  %1347 = vmatprep.mubr.bf16.mxu1 %v3339_v10  ;;  %v2873_v10 = vld [vmem:[#allocation7 + $0xe0] sm:$0xff]  }
 0x205   : > { %2726 = vmatprep.subr.bf16.mxu1 %v2873_v10 }
 0x206   : > { %2727 = vmatpush3.bf16.msra.mxu1 %v2875_v44 }
 0x207   : > { %2728 = vmatprep.subr.bf16.mxu1 %v2877_v22 }
 0x20a   : > { %2729 = vmatpush3.bf16.msra.mxu1 %v2879_v25 }
 0x20b   : > { %1235 = vmatmul.mubr.bf16.gmra.mxu0 %v521_v60  ;;  %1348 = vmatmul.mubr.bf16.gmra.mxu1 %v521_v60 }
 0x20c   : > { %2730 = vmatprep.subr.bf16.mxu1 %v2881_v27 }
 0x20e   : > { %2731 = vmatpush3.bf16.msra.mxu1 %v2883_v31 }
 0x20f   : > { %2732 = vmatprep.subr.bf16.mxu1 %v2885_v33 }
 0x212   : > { %2733 = vmatpush3.bf16.msra.mxu1 %v2887_v34 }
 0x213   : > { %2734 = vmatprep.subr.bf16.mxu1 %v2889_v35 }
 0x216   : > { %2735 = vmatpush3.bf16.msra.mxu1 %v2891_v48 }
 0x253   : > { %v3792_v3 = vpop.f32.mrf.mxu0  ;;  %v3794_v49 = vpop.f32.mrf.mxu1 }
 0x254   : > { %v2553_v50 = vmul.f32 -1.442695, %v3792_v3  ;;  %v2555_v53 = vmul.f32 -1.442695, %v3794_v49 }
 0x255   : > { %v3798_v54 = vpop.f32.mrf.mxu0  ;;  %v3800_v55 = vpop.f32.mrf.mxu1 }
 0x256   : > { %2924 = vpow2.f32 %v2553_v50  ;;  %v2554_v56 = vmul.f32 -1.442695, %v3798_v54  ;;  %v2556_v57 = vmul.f32 -1.442695, %v3800_v55 }
 0x257   : > { %2926 = vpow2.f32 %v2555_v53  ;;  %v3804_v13 = vpop.f32.mrf.mxu0  ;;  %v3806_v58 = vpop.f32.mrf.mxu1 }
 0x258   : > { %2928 = vpow2.f32 %v2554_v56  ;;  %v2557_v61 = vmul.f32 -1.442695, %v3804_v13  ;;  %v2559_v24 = vmul.f32 -1.442695, %v3806_v58 }
 0x259   : > { %2930 = vpow2.f32 %v2556_v57  ;;  %v3810_v62 = vpop.f32.mrf.mxu0  ;;  %v3812_v63 = vpop.f32.mrf.mxu1 }
 0x25a   : > { %2932 = vpow2.f32 %v2557_v61  ;;  %v2558_v0 = vmul.f32 -1.442695, %v3810_v62  ;;  %v2560_v23 = vmul.f32 -1.442695, %v3812_v63 }
 0x25b   : > { %2934 = vpow2.f32 %v2559_v24  ;;  %v3816_v29 = vpop.f32.mrf.mxu0  ;;  %v3818_v52 = vpop.f32.mrf.mxu1 }
 0x25c   : > { %2936 = vpow2.f32 %v2558_v0  ;;  %v2561_v1 = vmul.f32 -1.442695, %v3816_v29  ;;  %v2563_v2 = vmul.f32 -1.442695, %v3818_v52 }
 0x25d   : > { %2938 = vpow2.f32 %v2560_v23  ;;  %v3822_v5 = vpop.f32.mrf.mxu0  ;;  %v3824_v14 = vpop.f32.mrf.mxu1 }
 0x25e   : > { %2940 = vpow2.f32 %v2561_v1  ;;  %v2562_v6 = vmul.f32 -1.442695, %v3822_v5  ;;  %v2564_v42 = vmul.f32 -1.442695, %v3824_v14 }
 0x25f   : > { %2942 = vpow2.f32 %v2563_v2  ;;  %v3828_v51 = vpop.f32.mrf.mxu0  ;;  %v3830_v41 = vpop.f32.mrf.mxu1 }
 0x260   : > { %2944 = vpow2.f32 %v2562_v6  ;;  %v2565_v7 = vmul.f32 -1.442695, %v3828_v51  ;;  %v2567_v15 = vmul.f32 -1.442695, %v3830_v41 }
 0x261   : > { %2946 = vpow2.f32 %v2564_v42  ;;  %v3834_v38 = vpop.f32.mrf.mxu0  ;;  %v3836_v39 = vpop.f32.mrf.mxu1 }
 0x262   : > { %2948 = vpow2.f32 %v2565_v7  ;;  %v2566_v11 = vmul.f32 -1.442695, %v3834_v38  ;;  %v2568_v60 = vmul.f32 -1.442695, %v3836_v39 }
 0x263   : > { %v2925_v59 = vpop.eup %2924  ;;  %2950 = vpow2.f32 %v2567_v15  ;;  %v3840_v8 = vpop.f32.mrf.mxu0 }
 0x264   : > { %4347 = vst [vmem:[#allocation12_spill] sm:$0xff] %v3840_v8  ;;  %v3842_v30 = vpop.f32.mrf.mxu1  ;;  %v2927_v12 = vpop.eup %2926  ;;  %v1550_v9 = vadd.f32 1.0, %v2925_v59  ;;  %2952 = vpow2.f32 %v2566_v11 }
 0x265   : > { %4348 = vst [vmem:[#allocation13_spill] sm:$0xff] %v3842_v30  ;;  %v2929_v36 = vpop.eup %2928  ;;  %v1552_v40 = vadd.f32 1.0, %v2927_v12  ;;  %2954 = vpow2.f32 %v2568_v60  ;;  %v3844_v46 = vpop.f32.mrf.mxu0  ;;  %v2569_v60 = vmul.f32 -1.442695, %v3840_v8 }
 0x266   : > { %4349 = vst [vmem:[#allocation14_spill] sm:$0xff] %v3844_v46  ;;  %v3846_v47 = vpop.f32.mrf.mxu1  ;;  %v2931_v16 = vpop.eup %2930  ;;  %2956 = vrcp.f32 %v1550_v9  ;;  %v1551_v17 = vadd.f32 1.0, %v2929_v36  ;;  %v2571_v9 = vmul.f32 -1.442695, %v3842_v30 }
 0x267   : > { %4350 = vst [vmem:[#allocation15_spill] sm:$0xff] %v3846_v47  ;;  %v2933_v18 = vpop.eup %2932  ;;  %2958 = vrcp.f32 %v1552_v40  ;;  %v1553_v19 = vadd.f32 1.0, %v2931_v16  ;;  %v3848_v10 = vpop.f32.mrf.mxu0 }
 0x268   : > { %4351 = vst [vmem:[#allocation16_spill] sm:$0xff] %v3848_v10  ;;  %v3850_v20 = vpop.f32.mrf.mxu1  ;;  %v2935_v44 = vpop.eup %2934  ;;  %2960 = vrcp.f32 %v1551_v17  ;;  %v1554_v21 = vadd.f32 1.0, %v2933_v18  ;;  %v2570_v17 = vmul.f32 -1.442695, %v3844_v46 }
 0x269   : > { %4352 = vst [vmem:[#allocation17_spill] sm:$0xff] %v3850_v20  ;;  %v2937_v22 = vpop.eup %2936  ;;  %2962 = vrcp.f32 %v1553_v19  ;;  %v1556_v43 = vadd.f32 1.0, %v2935_v44  ;;  %v3852_v25 = vpop.f32.mrf.mxu0  ;;  %v2572_v19 = vmul.f32 -1.442695, %v3846_v47 }
 0x26a   : > { %4353 = vst [vmem:[#allocation18_spill] sm:$0xff] %v3852_v25  ;;  %v3854_v26 = vpop.f32.mrf.mxu1  ;;  %v2939_v27 = vpop.eup %2938  ;;  %2964 = vrcp.f32 %v1554_v21  ;;  %v1555_v28 = vadd.f32 1.0, %v2937_v22 }
 0x26b   : > { %4354 = vst [vmem:[#allocation19_spill] sm:$0xff] %v3854_v26  ;;  %v2941_v31 = vpop.eup %2940  ;;  %2966 = vrcp.f32 %v1556_v43  ;;  %v1557_v32 = vadd.f32 1.0, %v2939_v27  ;;  %v3856_v33 = vpop.f32.mrf.mxu0  ;;  %v2573_v43 = vmul.f32 -1.442695, %v3848_v10 }
 0x26c   : > { %4355 = vst [vmem:[#allocation20_spill] sm:$0xff] %v3856_v33  ;;  %v3858_v4 = vpop.f32.mrf.mxu1  ;;  %v2943_v34 = vpop.eup %2942  ;;  %2968 = vrcp.f32 %v1555_v28  ;;  %v1558_v37 = vadd.f32 1.0, %v2941_v31  ;;  %v2575_v28 = vmul.f32 -1.442695, %v3850_v20 }
 0x26d   : > { %4356 = vst [vmem:[#allocation21_spill] sm:$0xff] %v3858_v4  ;;  %v2945_v35 = vpop.eup %2944  ;;  %2970 = vrcp.f32 %v1557_v32  ;;  %v1560_v45 = vadd.f32 1.0, %v2943_v34  ;;  %v3860_v48 = vpop.f32.mrf.mxu0 }
 0x26e   : > { %4357 = vst [vmem:[#allocation22_spill] sm:$0xff] %v3860_v48  ;;  %v3862_v50 = vpop.f32.mrf.mxu1  ;;  %v2947_v53 = vpop.eup %2946  ;;  %2972 = vrcp.f32 %v1558_v37  ;;  %v1559_v56 = vadd.f32 1.0, %v2945_v35  ;;  %v2574_v37 = vmul.f32 -1.442695, %v3852_v25 }
 0x26f   : > { %4358 = vst [vmem:[#allocation23_spill] sm:$0xff] %v3862_v50  ;;  %v2949_v57 = vpop.eup %2948  ;;  %2974 = vrcp.f32 %v1560_v45  ;;  %v1561_v61 = vadd.f32 1.0, %v2947_v53  ;;  %v3864_v24 = vpop.f32.mrf.mxu0  ;;  %v2576_v45 = vmul.f32 -1.442695, %v3854_v26 }
 0x270   : > { %4359 = vst [vmem:[#allocation24_spill] sm:$0xff] %v3864_v24  ;;  %v3866_v0 = vpop.f32.mrf.mxu1  ;;  %v2951_v23 = vpop.eup %2950  ;;  %2976 = vrcp.f32 %v1559_v56  ;;  %v1562_v1 = vadd.f32 1.0, %v2949_v57 }
 0x271   : > { %4360 = vst [vmem:[#allocation25_spill] sm:$0xff] %v3866_v0  ;;  %v2953_v2 = vpop.eup %2952  ;;  %2978 = vrcp.f32 %v1561_v61  ;;  %v1564_v6 = vadd.f32 1.0, %v2951_v23  ;;  %v3868_v42 = vpop.f32.mrf.mxu0  ;;  %v2577_v61 = vmul.f32 -1.442695, %v3856_v33 }
 0x272   : > { %4361 = vst [vmem:[#allocation26_spill] sm:$0xff] %v3868_v42  ;;  %v3870_v7 = vpop.f32.mrf.mxu1  ;;  %v2955_v15 = vpop.eup %2954  ;;  %2980 = vrcp.f32 %v1562_v1  ;;  %v1563_v11 = vadd.f32 1.0, %v2953_v2  ;;  %v2579_v1 = vmul.f32 -1.442695, %v3858_v4 }
 0x273   : > { %4362 = vst [vmem:[#allocation27_spill] sm:$0xff] %v3870_v7  ;;  %v3873_v59 = vpop.eup %2956  ;;  %2982 = vrcp.f32 %v1564_v6  ;;  %v1565_v12 = vadd.f32 1.0, %v2955_v15  ;;  %v3876_v36 = vpop.f32.mrf.mxu0 }
 0x274   : > { %v3878_v40 = vpop.f32.mrf.mxu1  ;;  %v3880_v16 = vpop.eup %2958  ;;  %2984 = vrcp.f32 %v1563_v11  ;;  %v2578_v11 = vmul.f32 -1.442695, %v3860_v48 }
 0x275   : > { %4363 = vst [vmem:[#allocation28_spill] sm:$0xff] %v3878_v40  ;;  %v3883_v18 = vpop.eup %2960  ;;  %2986 = vrcp.f32 %v1565_v12  ;;  %v3886_v44 = vpop.f32.mrf.mxu0  ;;  %v2580_v12 = vmul.f32 -1.442695, %v3862_v50  ;;  %v2582_v50 = vmul.f32 -1.442695, %v3868_v42 }
 0x276   : > { %v3888_v21 = vpop.f32.mrf.mxu1  ;;  %v3890_v22 = vpop.eup %2962  ;;  %2988 = vpow2.f32 %v2569_v60 }
 0x277   : > { %4364 = vst [vmem:[#allocation29_spill] sm:$0xff] %v3888_v21  ;;  %v3893_v27 = vpop.eup %2964  ;;  %2990 = vpow2.f32 %v2571_v9  ;;  %v3896_v31 = vpop.f32.mrf.mxu0 }
 0x278   : > { %v3898_v32 = vpop.f32.mrf.mxu1  ;;  %v3900_v34 = vpop.eup %2966  ;;  %2992 = vpow2.f32 %v2570_v17 }
 0x279   : > { %4365 = vst [vmem:[#allocation30_spill] sm:$0xff] %v3898_v32  ;;  %v3903_v35 = vpop.eup %2968  ;;  %2994 = vpow2.f32 %v2572_v19  ;;  %v3906_v53 = vpop.f32.mrf.mxu0 }
 0x27a   : > { %v3908_v56 = vpop.f32.mrf.mxu1  ;;  %v3910_v57 = vpop.eup %2970  ;;  %2996 = vpow2.f32 %v2573_v43  ;;  %v2581_v43 = vmul.f32 -1.442695, %v3864_v24 }
 0x27b   : > { %v3913_v23 = vpop.eup %2972  ;;  %2998 = vpow2.f32 %v2575_v28  ;;  %v3916_v2 = vpop.f32.mrf.mxu0 }
 0x27c   : > { %v3918_v6 = vpop.f32.mrf.mxu1  ;;  %v3920_v15 = vpop.eup %2974  ;;  %3000 = vpow2.f32 %v2574_v37  ;;  %v2583_v37 = vmul.f32 -1.442695, %v3866_v0 }
 0x27d   : > { %4366 = vst [vmem:[#allocation31_spill] sm:$0xff] %v3918_v6  ;;  %v3923_v60 = vpop.eup %2976  ;;  %3002 = vpow2.f32 %v2576_v45  ;;  %v3926_v9 = vpop.f32.mrf.mxu0 }
 0x27e   : > { %4367 = vst [vmem:[#allocation32_spill] sm:$0xff] %v3926_v9  ;;  %v3928_v17 = vpop.f32.mrf.mxu1  ;;  %v3930_v19 = vpop.eup %2978  ;;  %3004 = vpow2.f32 %v2577_v61  ;;  %v2584_v61 = vmul.f32 -1.442695, %v3870_v7 }
 0x27f   : > { %4368 = vst [vmem:[#allocation33_spill] sm:$0xff] %v3928_v17  ;;  %v3933_v28 = vpop.eup %2980  ;;  %3006 = vpow2.f32 %v2579_v1  ;;  %v3936_v48 = vpop.f32.mrf.mxu0 }
 0x280   : > { %4369 = vst [vmem:[#allocation34_spill] sm:$0xff] %v3936_v48  ;;  %v3938_v4 = vpop.f32.mrf.mxu1  ;;  %v3940_v45 = vpop.eup %2982  ;;  %3008 = vpow2.f32 %v2578_v11 }
 0x281   : > { %4370 = vst [vmem:[#allocation35_spill] sm:$0xff] %v3938_v4  ;;  %v3943_v33 = vpop.eup %2984  ;;  %3010 = vpow2.f32 %v2580_v12  ;;  %v3946_v24 = vpop.f32.mrf.mxu0 }
 0x282   : > { %4371 = vst [vmem:[#allocation36_spill] sm:$0xff] %v3946_v24  ;;  %v3948_v26 = vpop.f32.mrf.mxu1  ;;  %v3950_v1 = vpop.eup %2986  ;;  %3012 = vpow2.f32 %v2581_v43 }
 0x283   : > { %v2989_v0 = vpop.eup %2988  ;;  %3014 = vpow2.f32 %v2583_v37  ;;  %v3952_v25 = vpop.f32.mrf.mxu0 }
 0x284   : > { %4372 = vst [vmem:[#allocation37_spill] sm:$0xff] %v3952_v25  ;;  %v3954_v20 = vpop.f32.mrf.mxu1  ;;  %v2991_v11 = vpop.eup %2990  ;;  %v1566_v42 = vadd.f32 1.0, %v2989_v0  ;;  %3016 = vpow2.f32 %v2582_v50 }
 0x285   : > { %4373 = vst [vmem:[#allocation38_spill] sm:$0xff] %v3954_v20  ;;  %v2993_v10 = vpop.eup %2992  ;;  %v1568_v12 = vadd.f32 1.0, %v2991_v11  ;;  %3018 = vpow2.f32 %v2584_v61  ;;  %v3956_v7 = vpop.f32.mrf.mxu0 }
 0x286   : > { %4374 = vst [vmem:[#allocation39_spill] sm:$0xff] %v3956_v7  ;;  %v3958_v47 = vpop.f32.mrf.mxu1  ;;  %v2995_v46 = vpop.eup %2994  ;;  %3020 = vrcp.f32 %v1566_v42  ;;  %v1567_v30 = vadd.f32 1.0, %v2993_v10 }
 0x287   : > { %4375 = vst [vmem:[#allocation40_spill] sm:$0xff] %v3958_v47  ;;  %v2997_v43 = vpop.eup %2996  ;;  %3022 = vrcp.f32 %v1568_v12  ;;  %v1569_v37 = vadd.f32 1.0, %v2995_v46  ;;  %v3960_v8 = vpop.f32.mrf.mxu0 }
 0x288   : > { %4376 = vst [vmem:[#allocation41_spill] sm:$0xff] %v3960_v8  ;;  %v3962_v25 = vpop.f32.mrf.mxu1  ;;  %v2999_v20 = vpop.eup %2998  ;;  %3024 = vrcp.f32 %v1567_v30  ;;  %v1570_v50 = vadd.f32 1.0, %v2997_v43  ;;  %v3974_v30 = vmul.f32 %v3873_v59, %v3792_v3  ;;  %v2585_v43 = vmul.f32 -1.442695, %v3876_v36 }
 0x289   : > { %4377 = vst [vmem:[#allocation42_spill] sm:$0xff] %v3962_v25  ;;  %v3001_v0 = vpop.eup %3000  ;;  %3026 = vrcp.f32 %v1569_v37  ;;  %v1572_v61 = vadd.f32 1.0, %v2999_v20  ;;  %v3964_v11 = vpop.f32.mrf.mxu0  ;;  %v3988_v3 = vmul.f32 %v3883_v18, %v3798_v54  ;;  %v1746_v54 = vmul.f32 %v3893_v27, %v3804_v13 }
 0x28a   : > { %v3966_v7 = vpop.f32.mrf.mxu1  ;;  %v3003_v47 = vpop.eup %3002  ;;  %3028 = vrcp.f32 %v1570_v50  ;;  %v1571_v10 = vadd.f32 1.0, %v3001_v0  ;;  %v3979_v50 = vmul.f32 %v3880_v16, %v3794_v49  ;;  %v2587_v0 = vmul.f32 -1.442695, %v3878_v40 }
 0x28b   : > { %v3005_v42 = vpop.eup %3004  ;;  %3030 = vrcp.f32 %v1572_v61  ;;  %v1573_v46 = vadd.f32 1.0, %v3003_v47  ;;  %v3968_v12 = vpop.f32.mrf.mxu0  ;;  %v3993_v49 = vmul.f32 %v3890_v22, %v3800_v55  ;;  %v2588_v16 = vmul.f32 -1.442695, %v3888_v21 }
 0x28c   : > { %4378 = vst [vmem:[#allocation43_spill] sm:$0xff] %v3968_v12  ;;  %v3970_v8 = vpop.f32.mrf.mxu1  ;;  %v3007_v25 = vpop.eup %3006  ;;  %3032 = vrcp.f32 %v1571_v10  ;;  %v1574_v20 = vadd.f32 1.0, %v3005_v42  ;;  %v2586_v10 = vmul.f32 -1.442695, %v3886_v44  ;;  %v1748_v55 = vmul.f32 %v3900_v34, %v3806_v58 }
 0x28d   : > { %4379 = vst [vmem:[#allocation44_spill] sm:$0xff] %v3970_v8  ;;  %v3009_v37 = vpop.eup %3008  ;;  %3034 = vrcp.f32 %v1573_v46  ;;  %v1576_v47 = vadd.f32 1.0, %v3007_v25  ;;  %v3982_v61 = vpop.f32.mrf.mxu0  ;;  %v1747_v13 = vmul.f32 %v3903_v35, %v3810_v62  ;;  %v1749_v58 = vmul.f32 %v3910_v57, %v3812_v63 }
 0x28e   : > { %v3984_v8 = vpop.f32.mrf.mxu1  ;;  %v3011_v12 = vpop.eup %3010  ;;  %3036 = vrcp.f32 %v1574_v20  ;;  %v1575_v59 = vadd.f32 1.0, %v3009_v37  ;;  %v2589_v20 = vmul.f32 -1.442695, %v3896_v31  ;;  %v2592_v34 = vmul.f32 -1.442695, %v3908_v56 }
 0x28f   : > { %4380 = vst [vmem:[#allocation45_spill] sm:$0xff] %v3984_v8  ;;  %v3013_v42 = vpop.eup %3012  ;;  %3038 = vrcp.f32 %v1576_v47  ;;  %v1577_v25 = vadd.f32 1.0, %v3011_v12  ;;  %v3996_v46 = vpop.f32.mrf.mxu0  ;;  %v2591_v12 = vmul.f32 -1.442695, %v3898_v32  ;;  %v4020_v32 = vmul.f32 %v3913_v23, %v3816_v29 }
 0x290   : > { %v3998_v40 = vpop.f32.mrf.mxu1  ;;  %v3015_v8 = vpop.eup %3014  ;;  %3040 = vrcp.f32 %v1575_v59  ;;  %v1578_v18 = vadd.f32 1.0, %v3013_v42  ;;  %v2590_v59 = vmul.f32 -1.442695, %v3906_v53  ;;  %v2593_v62 = vmul.f32 -1.442695, %v3916_v2 }
 0x291   : > { %4381 = vst [vmem:[#allocation46_spill] sm:$0xff] %v3998_v40  ;;  %v3017_v37 = vpop.eup %3016  ;;  %3042 = vrcp.f32 %v1577_v25  ;;  %v1580_v22 = vadd.f32 1.0, %v3015_v8  ;;  %v4006_v47 = vpop.f32.mrf.mxu0  ;;  %v4024_v35 = vmul.f32 -1.442695, %v3918_v6  ;;  %v4028_v63 = vmul.f32 %v3920_v15, %v3818_v52 }
 0x292   : > { %4382 = vst [vmem:[#allocation47_spill] sm:$0xff] %v4006_v47  ;;  %v4008_v21 = vpop.f32.mrf.mxu1  ;;  %v3019_v40 = vpop.eup %3018  ;;  %3044 = vrcp.f32 %v1578_v18  ;;  %v1579_v27 = vadd.f32 1.0, %v3017_v37  ;;  %v4035_v57 = vmul.f32 -1.442695, %v3926_v9  ;;  %v4046_v52 = vmul.f32 -1.442695, %v3928_v17 }
 0x293   : > { %4383 = vst [vmem:[#allocation48_spill] sm:$0xff] %v4008_v21  ;;  %v4013_v42 = vpop.eup %3020  ;;  %3046 = vrcp.f32 %v1580_v22  ;;  %v1581_v8 = vadd.f32 1.0, %v3019_v40  ;;  %v1166_v25 = vpop.f32.mrf.mxu0  ;;  %v4032_v40 = vmul.f32 %v3923_v60, %v3822_v5  ;;  %v4039_v22 = vmul.f32 %v3930_v19, %v3824_v14 }
 0x294   : > { %v1279_v47 = vpop.f32.mrf.mxu1  ;;  %v3023_v21 = vpop.eup %3022  ;;  %3048 = vrcp.f32 %v1579_v27  ;;  %v4043_v27 = vmul.f32 %v3933_v28, %v3828_v51  ;;  %v4049_v15 = vmul.f32 -1.442695, %v3936_v48  ;;  %v4052_v60 = vmul.f32 -1.442695, %v3938_v4 }
 0x295   : > { %v3025_v18 = vpop.eup %3024  ;;  %3050 = vrcp.f32 %v1581_v8  ;;  %v1168_v29 = vpop.f32.mrf.mxu0  ;;  %v1806_v8 = vmul.f32 %v3974_v30, %v1166_v25  ;;  %v1808_v51 = vmul.f32 %v3979_v50, %v1279_v47  ;;  %v4060_v48 = vmul.f32 %v3943_v33, %v3834_v38 }
 0x296   : > { %v1281_v23 = vpop.f32.mrf.mxu1  ;;  %v3027_v37 = vpop.eup %3026  ;;  %3052 = vpow2.f32 %v2585_v43  ;;  %v4063_v4 = vmul.f32 -1.442695, %v3946_v24  ;;  %v1807_v50 = vmul.f32 %v3988_v3, %v1168_v29  ;;  %v4385_v29 = vld [vmem:[#allocation38_spill] sm:$0xff] }
 0x297   : > { %v3029_v5 = vpop.eup %3028  ;;  %3054 = vpow2.f32 %v2587_v0  ;;  %v1170_v14 = vpop.f32.mrf.mxu0  ;;  %v1756_v0 = vmul.f32 %v3940_v45, %v3830_v41  ;;  %v1809_v41 = vmul.f32 %v3993_v49, %v1281_v23 }
 0x298   : > { %v1283_v19 = vpop.f32.mrf.mxu1  ;;  %v3031_v9 = vpop.eup %3030  ;;  %3056 = vpow2.f32 %v2586_v10  ;;  %v1810_v28 = vmul.f32 %v1746_v54, %v1170_v14  ;;  %v1757_v14 = vmul.f32 %v3950_v1, %v3836_v39  ;;  %v4387_v39 = vld [vmem:[#allocation13_spill] sm:$0xff] }
 0x299   : > { %v1812_v43 = vmul.f32 %v1748_v55, %v1283_v19  ;;  %v3033_v17 = vpop.eup %3032  ;;  %3058 = vpow2.f32 %v2588_v16  ;;  %v1172_v30 = vpop.f32.mrf.mxu0  ;;  %v2600_v19 = vmul.f32 -1.442695, %v3948_v26  ;;  %v1760_v1 = vmul.f32 %v3023_v21, %v4387_v39  ;;  %v4394_v39 = vld [vmem:[#allocation20_spill] sm:$0xff] }
 0x29a   : > { %v1285_v25 = vpop.f32.mrf.mxu1  ;;  %v3035_v6 = vpop.eup %3034  ;;  %3060 = vpow2.f32 %v2589_v20  ;;  %v1870_v10 = vpack.c.bf16 %v1810_v28, %v1806_v8  ;;  %v1811_v45 = vmul.f32 %v1747_v13, %v1172_v30  ;;  %v4384_v20 = vld [vmem:[#allocation37_spill] sm:$0xff] }
 0x29b   : > { %v1872_v54 = vpack.c.bf16 %v1812_v43, %v1808_v51  ;;  %v3037_v55 = vpop.eup %3036  ;;  %3062 = vpow2.f32 %v2591_v12  ;;  %v1813_v47 = vmul.f32 %v1749_v58, %v1285_v25  ;;  %v1176_v38 = vpop.f32.mrf.mxu0  ;;  %v4071_v24 = vmul.f32 -1.442695, %v4384_v20  ;;  %v4386_v51 = vld [vmem:[#allocation12_spill] sm:$0xff] }
 0x29c   : > { %v1289_v33 = vpop.f32.mrf.mxu1  ;;  %v3039_v16 = vpop.eup %3038  ;;  %3064 = vpow2.f32 %v2590_v59  ;;  %v4074_v12 = vmul.f32 -1.442695, %v4385_v29  ;;  %v1871_v49 = vpack.c.bf16 %v1811_v45, %v1807_v50  ;;  %v1758_v28 = vmul.f32 %v4013_v42, %v4386_v51  ;;  %v4388_v59 = vld [vmem:[#allocation14_spill] sm:$0xff]  ;;  %v4390_v29 = vld [vmem:[#allocation16_spill] sm:$0xff] }
 0x29d   : > { %v3041_v3 = vpop.eup %3040  ;;  %3066 = vpow2.f32 %v2592_v34  ;;  %v1873_v13 = vpack.c.bf16 %v1813_v47, %v1809_v41  ;;  %v1178_v58 = vpop.f32.mrf.mxu0  ;;  %v4080_v43 = vmul.f32 %v3025_v18, %v4388_v59  ;;  %v4389_v34 = vld [vmem:[#allocation15_spill] sm:$0xff]  ;;  %v1762_v50 = vmul.f32 %v3029_v5, %v4390_v29 }
 0x29e   : > { %v1291_v23 = vpop.f32.mrf.mxu1  ;;  %v3043_v8 = vpop.eup %3042  ;;  %3068 = vpow2.f32 %v2593_v62  ;;  %v4085_v25 = vmul.f32 %v3027_v37, %v4389_v34  ;;  %v1814_v41 = vmul.f32 %v4020_v32, %v1176_v38  ;;  %2190 = vmatprep.mubr.bf16.mxu0 %v1871_v49  ;;  %v1816_v62 = vmul.f32 %v4028_v63, %v1289_v33  ;;  %v4392_v32 = vld [vmem:[#allocation18_spill] sm:$0xff]  ;;  %v4393_v29 = vld [vmem:[#allocation19_spill] sm:$0xff]  ;;  %v4395_v34 = vld [vmem:[#allocation21_spill] sm:$0xff] }
 0x29f   : > { %v4082_v30 = vpop.eup %3044  ;;  %3070 = vpow2.f32 %v4024_v35  ;;  %2287 = vmatprep.mubr.bf16.mxu1 %v1873_v13  ;;  %v1180_v42 = vpop.f32.mrf.mxu0  ;;  %2191 = vmatmul.mubr.bf16.vlgmr.msra.gmra.mxu0 %v1870_v10  ;;  %v4391_v35 = vld [vmem:[#allocation17_spill] sm:$0xff]  ;;  %v4099_v38 = vmul.f32 %v3033_v17, %v4392_v32  ;;  %v4102_v49 = vmul.f32 %v3035_v6, %v4393_v29  ;;  %v4113_v59 = vmul.f32 %v3037_v55, %v4394_v39 }
 0x2a0   : > { %v1293_v45 = vpop.f32.mrf.mxu1  ;;  %v4090_v21 = vpop.eup %3046  ;;  %3072 = vpow2.f32 %v4035_v57  ;;  %v1818_v18 = vmul.f32 %v4043_v27, %v1180_v42  ;;  %2288 = vmatmul.mubr.bf16.vlgmr.msra.gmra.mxu1 %v1872_v54  ;;  %v1764_v47 = vmul.f32 %v3031_v9, %v4391_v35  ;;  %v1815_v27 = vmul.f32 %v4032_v40, %v1178_v58  ;;  %v4396_v42 = vld [vmem:[#allocation22_spill] sm:$0xff] }
 0x2a1   : > { %v1820_v37 = vmul.f32 %v1756_v0, %v1293_v45  ;;  %v4095_v5 = vpop.eup %3048  ;;  %3074 = vpow2.f32 %v4046_v52  ;;  %v1182_v57 = vpop.f32.mrf.mxu0  ;;  %v1817_v9 = vmul.f32 %v4039_v22, %v1291_v23  ;;  %v4120_v45 = vmul.f32 %v3041_v3, %v4396_v42 }
 0x2a2   : > { %v1295_v13 = vpop.f32.mrf.mxu1  ;;  %v4105_v63 = vpop.eup %3050  ;;  %3076 = vpow2.f32 %v4049_v15  ;;  %v1874_v0 = vpack.c.bf16 %v1818_v18, %v1814_v41  ;;  %v1819_v6 = vmul.f32 %v4060_v48, %v1182_v57  ;;  %v4116_v15 = vmul.f32 %v3039_v16, %v4395_v34 }
 0x2a3   : > { %v1876_v10 = vpack.c.bf16 %v1820_v37, %v1816_v62  ;;  %v3053_v54 = vpop.eup %3052  ;;  %3078 = vpow2.f32 %v4052_v60  ;;  %v1821_v17 = vmul.f32 %v1757_v14, %v1295_v13  ;;  %v1186_v33 = vpop.f32.mrf.mxu0  ;;  %v4397_v62 = vld [vmem:[#allocation23_spill] sm:$0xff] }
 0x2a4   : > { %v1299_v52 = vpop.f32.mrf.mxu1  ;;  %v3055_v51 = vpop.eup %3054  ;;  %v1582_v40 = vadd.f32 1.0, %v3053_v54  ;;  %3080 = vpow2.f32 %v4063_v4  ;;  %v1875_v60 = vpack.c.bf16 %v1819_v6, %v1815_v27  ;;  %v4123_v55 = vmul.f32 %v3043_v8, %v4397_v62 }
 0x2a5   : > { %v3057_v58 = vpop.eup %3056  ;;  %v1584_v41 = vadd.f32 1.0, %v3055_v51  ;;  %3082 = vpow2.f32 %v2600_v19  ;;  %v1877_v22 = vpack.c.bf16 %v1821_v17, %v1817_v9  ;;  %v1188_v23 = vpop.f32.mrf.mxu0  ;;  %v4125_v4 = vmul.f32 %v1758_v28, %v1186_v33 }
 0x2a6   : > { %v1301_v48 = vpop.f32.mrf.mxu1  ;;  %v3059_v14 = vpop.eup %3058  ;;  %3084 = vrcp.f32 %v1582_v40  ;;  %v1583_v16 = vadd.f32 1.0, %v3057_v58  ;;  %v4127_v35 = vmul.f32 %v1760_v1, %v1299_v52  ;;  %2198 = vmatprep.mubr.bf16.mxu0 %v1875_v60  ;;  %v1823_v54 = vmul.f32 %v4080_v43, %v1188_v23  ;;  %v4399_v40 = vld [vmem:[#allocation25_spill] sm:$0xff] }
 0x2a7   : > { %v3061_v18 = vpop.eup %3060  ;;  %3086 = vrcp.f32 %v1584_v41  ;;  %v1585_v37 = vadd.f32 1.0, %v3059_v14  ;;  %2295 = vmatprep.mubr.bf16.mxu1 %v1877_v22  ;;  %v1190_v19 = vpop.f32.mrf.mxu0  ;;  %2199 = vmatmul.mubr.bf16.gmra.mxu0 %v1874_v0  ;;  %v1825_v28 = vmul.f32 %v4085_v25, %v1301_v48  ;;  %v4398_v25 = vld [vmem:[#allocation24_spill] sm:$0xff]  ;;  %v1772_v58 = vmul.f32 %v4090_v21, %v4399_v40 }
 0x2a8   : > { %v1303_v32 = vpop.f32.mrf.mxu1  ;;  %v3063_v29 = vpop.eup %3062  ;;  %3088 = vrcp.f32 %v1583_v16  ;;  %v1586_v3 = vadd.f32 1.0, %v3061_v18  ;;  %v1826_v57 = vmul.f32 %v1762_v50, %v1190_v19  ;;  %2296 = vmatmul.mubr.bf16.gmra.mxu1 %v1876_v10  ;;  %v1770_v34 = vmul.f32 %v4082_v30, %v4398_v25  ;;  %v4401_v16 = vld [vmem:[#allocation27_spill] sm:$0xff] }
 0x2a9   : > { %v1828_v13 = vmul.f32 %v1764_v47, %v1303_v32  ;;  %v3065_v8 = vpop.eup %3064  ;;  %3090 = vrcp.f32 %v1585_v37  ;;  %v1588_v27 = vadd.f32 1.0, %v3063_v29  ;;  %v1192_v1 = vpop.f32.mrf.mxu0  ;;  %v1773_v18 = vmul.f32 %v4105_v63, %v4401_v16  ;;  %v4407_v16 = vld [vmem:[#allocation44_spill] sm:$0xff] }
 0x2aa   : > { %v1305_v9 = vpop.f32.mrf.mxu1  ;;  %v3067_v6 = vpop.eup %3066  ;;  %3092 = vrcp.f32 %v1586_v3  ;;  %v1587_v17 = vadd.f32 1.0, %v3065_v8  ;;  %v1878_v33 = vpack.c.bf16 %v1826_v57, %v4125_v4  ;;  %v1827_v0 = vmul.f32 %v4099_v38, %v1192_v1 }
 0x2ab   : > { %v1880_v52 = vpack.c.bf16 %v1828_v13, %v4127_v35  ;;  %v3069_v50 = vpop.eup %3068  ;;  %3094 = vrcp.f32 %v1588_v27  ;;  %v1589_v47 = vadd.f32 1.0, %v3067_v6  ;;  %v1829_v10 = vmul.f32 %v4102_v49, %v1305_v9  ;;  %v1196_v51 = vpop.f32.mrf.mxu0  ;;  %v4400_v49 = vld [vmem:[#allocation26_spill] sm:$0xff] }
 0x2ac   : > { %v1309_v43 = vpop.f32.mrf.mxu1  ;;  %v3071_v39 = vpop.eup %3070  ;;  %3096 = vrcp.f32 %v1587_v17  ;;  %v1590_v41 = vadd.f32 1.0, %v3069_v50  ;;  %v1879_v23 = vpack.c.bf16 %v1827_v0, %v1823_v54  ;;  %v1771_v62 = vmul.f32 %v4095_v5, %v4400_v49 }
 0x2ad   : > { %v3073_v60 = vpop.eup %3072  ;;  %3098 = vrcp.f32 %v1589_v47  ;;  %v1592_v22 = vadd.f32 1.0, %v3071_v39  ;;  %v1881_v48 = vpack.c.bf16 %v1829_v10, %v1825_v28  ;;  %v1198_v14 = vpop.f32.mrf.mxu0  ;;  %v4144_v4 = vmul.f32 %v4113_v59, %v1196_v51  ;;  %v4403_v10 = vld [vmem:[#allocation40_spill] sm:$0xff] }
 0x2ae   : > { %v1311_v38 = vpop.f32.mrf.mxu1  ;;  %v3075_v42 = vpop.eup %3074  ;;  %3100 = vrcp.f32 %v1590_v41  ;;  %v1591_v30 = vadd.f32 1.0, %v3073_v60  ;;  %v4147_v35 = vmul.f32 %v4116_v15, %v1309_v43  ;;  %2206 = vmatprep.mubr.bf16.mxu0 %v1879_v23  ;;  %v1831_v59 = vmul.f32 %v4120_v45, %v1198_v14  ;;  %v4404_v43 = vld [vmem:[#allocation41_spill] sm:$0xff] }
 0x2af   : > { %v3077_v37 = vpop.eup %3076  ;;  %3102 = vrcp.f32 %v1592_v22  ;;  %v1593_v21 = vadd.f32 1.0, %v3075_v42  ;;  %2303 = vmatprep.mubr.bf16.mxu1 %v1881_v48  ;;  %v1200_v19 = vpop.f32.mrf.mxu0  ;;  %2207 = vmatmul.mubr.bf16.gmra.mxu0 %v1878_v33  ;;  %v1833_v8 = vmul.f32 %v4123_v55, %v1311_v38  ;;  %v4402_v55 = vld [vmem:[#allocation39_spill] sm:$0xff]  ;;  %v2604_v51 = vmul.f32 -1.442695, %v4403_v10 }
 0x2b0   : > { %v1313_v32 = vpop.f32.mrf.mxu1  ;;  %v3079_v29 = vpop.eup %3078  ;;  %3104 = vrcp.f32 %v1591_v30  ;;  %v1594_v5 = vadd.f32 1.0, %v3077_v37  ;;  %v1834_v3 = vmul.f32 %v1770_v34, %v1200_v19  ;;  %2304 = vmatmul.mubr.bf16.gmra.mxu1 %v1880_v52  ;;  %v2602_v0 = vmul.f32 -1.442695, %v4402_v55  ;;  %v4405_v34 = vld [vmem:[#allocation42_spill] sm:$0xff]  ;;  %v4406_v38 = vld [vmem:[#allocation43_spill] sm:$0xff] }
 0x2b1   : > { %v1836_v63 = vmul.f32 %v1772_v58, %v1313_v32  ;;  %v3081_v57 = vpop.eup %3080  ;;  %3106 = vrcp.f32 %v1593_v21  ;;  %v1596_v13 = vadd.f32 1.0, %v3079_v29  ;;  %v1202_v15 = vpop.f32.mrf.mxu0  ;;  %v2605_v39 = vmul.f32 -1.442695, %v4404_v43 }
 0x2b2   : > { %v1315_v27 = vpop.f32.mrf.mxu1  ;;  %v3083_v54 = vpop.eup %3082  ;;  %3108 = vrcp.f32 %v1594_v5  ;;  %v1595_v28 = vadd.f32 1.0, %v3081_v57  ;;  %v1882_v1 = vpack.c.bf16 %v1834_v3, %v4144_v4  ;;  %v1835_v33 = vmul.f32 %v1771_v62, %v1202_v15 }
 0x2b3   : > { %v1884_v9 = vpack.c.bf16 %v1836_v63, %v4147_v35  ;;  %v3085_v6 = vpop.eup %3084  ;;  %3110 = vrcp.f32 %v1596_v13  ;;  %v1597_v17 = vadd.f32 1.0, %v3083_v54  ;;  %v1837_v52 = vmul.f32 %v1773_v18, %v1315_v27  ;;  %v1206_v50 = vpop.f32.mrf.mxu0  ;;  %v4408_v35 = vld [vmem:[#allocation45_spill] sm:$0xff] }
 0x2b4   : > { %v4153_v47 = vpop.f32.mrf.mxu1  ;;  %v3087_v45 = vpop.eup %3086  ;;  %3112 = vrcp.f32 %v1595_v28  ;;  %v2607_v40 = vmul.f32 -1.442695, %v4405_v34  ;;  %v1883_v58 = vpack.c.bf16 %v1835_v33, %v1831_v59  ;;  %v2606_v48 = vmul.f32 -1.442695, %v3964_v11  ;;  %v4410_v59 = vld [vmem:[#allocation30_spill] sm:$0xff]  ;;  %v4411_v54 = vld [vmem:[#allocation29_spill] sm:$0xff] }
 0x2b5   : > { %v3089_v25 = vpop.eup %3088  ;;  %3114 = vrcp.f32 %v1597_v17  ;;  %v1885_v41 = vpack.c.bf16 %v1837_v52, %v1833_v8  ;;  %v1208_v60 = vpop.f32.mrf.mxu0  ;;  %v2608_v14 = vmul.f32 -1.442695, %v3966_v7  ;;  %v2609_v42 = vmul.f32 -1.442695, %v4406_v38 }
 0x2b6   : > { %v1321_v22 = vpop.f32.mrf.mxu1  ;;  %v3091_v23 = vpop.eup %3090  ;;  %3116 = vpow2.f32 %v4071_v24  ;;  %v1774_v62 = vmul.f32 %v3085_v6, %v3876_v36  ;;  %v2611_v18 = vmul.f32 -1.442695, %v4407_v16  ;;  %v2610_v30 = vmul.f32 -1.442695, %v3982_v61  ;;  %2214 = vmatprep.mubr.bf16.mxu0 %v1883_v58 }
 0x2b7   : > { %v3093_v49 = vpop.eup %3092  ;;  %3118 = vpow2.f32 %v4074_v12  ;;  %2311 = vmatprep.mubr.bf16.mxu1 %v1885_v41  ;;  %v1210_v37 = vpop.f32.mrf.mxu0  ;;  %v2612_v19 = vmul.f32 -1.442695, %v4408_v35  ;;  %v4170_v32 = vmul.f32 -1.442695, %v3996_v46  ;;  %2215 = vmatmul.mubr.bf16.gmra.mxu0 %v1882_v1  ;;  %v4409_v12 = vld [vmem:[#allocation28_spill] sm:$0xff]  ;;  %v1775_v5 = vmul.f32 %v3089_v25, %v3886_v44 }
 0x2b8   : > { %v1323_v21 = vpop.f32.mrf.mxu1  ;;  %v3095_v24 = vpop.eup %3094  ;;  %v1778_v4 = vmul.f32 %v3093_v49, %v3896_v31  ;;  %3120 = vpow2.f32 %v2602_v0  ;;  %2312 = vmatmul.mubr.bf16.gmra.mxu1 %v1884_v9  ;;  %v1776_v29 = vmul.f32 %v3087_v45, %v4409_v12  ;;  %v1838_v3 = vmul.f32 %v1774_v62, %v1206_v50  ;;  %v4414_v62 = vld [vmem:[#allocation48_spill] sm:$0xff]  ;;  %v4416_v12 = vld [vmem:[#allocation34_spill] sm:$0xff] }
 0x2b9   : > { %v3097_v36 = vpop.eup %3096  ;;  %3122 = vpow2.f32 %v2604_v51  ;;  %v1212_v63 = vpop.f32.mrf.mxu0  ;;  %v1780_v31 = vmul.f32 %v3095_v24, %v4410_v59  ;;  %v1777_v28 = vmul.f32 %v3091_v23, %v4411_v54  ;;  %v1839_v9 = vmul.f32 %v1775_v5, %v1208_v60  ;;  %v4419_v59 = vld [vmem:[#allocation33_spill] sm:$0xff] }
 0x2ba   : > { %v1325_v57 = vpop.f32.mrf.mxu1  ;;  %v3099_v13 = vpop.eup %3098  ;;  %v1779_v8 = vmul.f32 %v3097_v36, %v3906_v53  ;;  %3124 = vpow2.f32 %v2605_v39  ;;  %v1842_v15 = vmul.f32 %v1778_v4, %v1210_v37  ;;  %v4412_v53 = vld [vmem:[#allocation46_spill] sm:$0xff]  ;;  %v1840_v60 = vmul.f32 %v1776_v29, %v4153_v47  ;;  %v4415_v4 = vld [vmem:[#allocation31_spill] sm:$0xff]  ;;  %v4417_v47 = vld [vmem:[#allocation32_spill] sm:$0xff] }
 0x2bb   : > { %v3101_v27 = vpop.eup %3100  ;;  %v1781_v1 = vmul.f32 %v3099_v13, %v3908_v56  ;;  %3126 = vpow2.f32 %v2607_v40  ;;  %v1216_v6 = vpop.f32.mrf.mxu0  ;;  %v1844_v52 = vmul.f32 %v1780_v31, %v1323_v21  ;;  %v2615_v0 = vmul.f32 -1.442695, %v4412_v53  ;;  %v4413_v56 = vld [vmem:[#allocation47_spill] sm:$0xff] }
 0x2bc   : > { %v4178_v44 = vpop.f32.mrf.mxu1  ;;  %v3103_v17 = vpop.eup %3102  ;;  %3128 = vpow2.f32 %v2606_v48  ;;  %v1886_v33 = vpack.c.bf16 %v1842_v15, %v1838_v3  ;;  %v1843_v50 = vmul.f32 %v1779_v8, %v1212_v63  ;;  %v1841_v51 = vmul.f32 %v1777_v28, %v1321_v22  ;;  %v4418_v63 = vld [vmem:[#allocation35_spill] sm:$0xff]  ;;  %v4420_v8 = vld [vmem:[#allocation36_spill] sm:$0xff] }
 0x2bd   : > { %v3105_v45 = vpop.eup %3104  ;;  %3130 = vpow2.f32 %v2608_v14  ;;  %v1845_v39 = vmul.f32 %v1781_v1, %v1325_v57  ;;  %v1218_v25 = vpop.f32.mrf.mxu0  ;;  %v2614_v40 = vmul.f32 -1.442695, %v4413_v56  ;;  %v1782_v48 = vmul.f32 %v3101_v27, %v3916_v2 }
 0x2be   : > { %v1331_v58 = vpop.f32.mrf.mxu1  ;;  %v3107_v41 = vpop.eup %3106  ;;  %3132 = vpow2.f32 %v2609_v42  ;;  %v1887_v23 = vpack.c.bf16 %v1843_v50, %v1839_v9  ;;  %v2616_v37 = vmul.f32 -1.442695, %v4414_v62  ;;  %v1784_v36 = vmul.f32 %v3103_v17, %v4415_v4 }
 0x2bf   : > { %v3109_v49 = vpop.eup %3108  ;;  %3134 = vpow2.f32 %v2611_v18  ;;  %v1889_v14 = vpack.c.bf16 %v1845_v39, %v1841_v51  ;;  %v1220_v21 = vpop.f32.mrf.mxu0  ;;  %v1888_v42 = vpack.c.bf16 %v1844_v52, %v1840_v60  ;;  %v1783_v29 = vmul.f32 %v3105_v45, %v4417_v47 }
 0x2c0   : > { %v1333_v24 = vpop.f32.mrf.mxu1  ;;  %v3111_v22 = vpop.eup %3110  ;;  %v1786_v5 = vmul.f32 %v3109_v49, %v4416_v12  ;;  %3136 = vpow2.f32 %v2610_v30  ;;  %2222 = vmatprep.mubr.bf16.mxu0 %v1887_v23  ;;  %v1846_v2 = vmul.f32 %v1782_v48, %v1216_v6  ;;  %v1785_v31 = vmul.f32 %v3107_v41, %v4419_v59 }
 0x2c1   : > { %v3113_v3 = vpop.eup %3112  ;;  %v1788_v57 = vmul.f32 %v3111_v22, %v4418_v63  ;;  %3138 = vpow2.f32 %v2612_v19  ;;  %2319 = vmatprep.mubr.bf16.mxu1 %v1889_v14  ;;  %2223 = vmatmul.mubr.bf16.gmra.mxu0 %v1886_v33  ;;  %v1222_v18 = vpop.f32.mrf.mxu0  ;;  %v1847_v1 = vmul.f32 %v1783_v29, %v1218_v25 }
 0x2c2   : > { %v3115_v13 = vpop.eup %3114  ;;  %v1787_v15 = vmul.f32 %v3113_v3, %v4420_v8  ;;  %3140 = vpow2.f32 %v4170_v32  ;;  %v1850_v30 = vmul.f32 %v1786_v5, %v1220_v21  ;;  %2320 = vmatmul.mubr.bf16.gmra.mxu1 %v1888_v42  ;;  %v1335_v27 = vpop.f32.mrf.mxu1  ;;  %v1849_v45 = vmul.f32 %v1785_v31, %v1331_v58 }
 0x2c3   : > { %v3117_v54 = vpop.eup %3116  ;;  %v1789_v28 = vmul.f32 %v3115_v13, %v3948_v26  ;;  %3142 = vpow2.f32 %v2615_v0  ;;  %v1852_v19 = vmul.f32 %v1788_v57, %v1333_v24  ;;  %v4193_v32 = vpop.f32.mrf.mxu0  ;;  %v1848_v26 = vmul.f32 %v1784_v36, %v4178_v44 }
 0x2c4   : > { %v3119_v9 = vpop.eup %3118  ;;  %v1598_v6 = vadd.f32 1.0, %v3117_v54  ;;  %3144 = vpow2.f32 %v2614_v40  ;;  %v1890_v17 = vpack.c.bf16 %v1850_v30, %v1846_v2  ;;  %v1851_v33 = vmul.f32 %v1787_v15, %v1222_v18  ;;  %v4196_v25 = vpop.f32.mrf.mxu1 }
 0x2c5   : > { %v3121_v52 = vpop.eup %3120  ;;  %v1600_v50 = vadd.f32 1.0, %v3119_v9  ;;  %3146 = vpow2.f32 %v2616_v37  ;;  %v1853_v51 = vmul.f32 %v1789_v28, %v1335_v27  ;;  %v1892_v37 = vpack.c.bf16 %v1852_v19, %v1848_v26  ;;  %v4198_v21 = vpop.f32.mrf.mxu0 }
 0x2c6   : > { %v3123_v39 = vpop.eup %3122  ;;  %3148 = vrcp.f32 %v1598_v6  ;;  %v1599_v41 = vadd.f32 1.0, %v3121_v52  ;;  %v1891_v0 = vpack.c.bf16 %v1851_v33, %v1847_v1  ;;  %v1341_v22 = vpop.f32.mrf.mxu1 }
 0x2c7   : > { %v3125_v60 = vpop.eup %3124  ;;  %3150 = vrcp.f32 %v1600_v50  ;;  %v1601_v40 = vadd.f32 1.0, %v3123_v39  ;;  %v1893_v23 = vpack.c.bf16 %v1853_v51, %v1849_v45  ;;  %v1230_v47 = vpop.f32.mrf.mxu0 }
 0x2c8   : > { %v3127_v49 = vpop.eup %3126  ;;  %3152 = vrcp.f32 %v1599_v41  ;;  %v1602_v48 = vadd.f32 1.0, %v3125_v60  ;;  %2230 = vmatprep.mubr.bf16.mxu0 %v1891_v0  ;;  %v1343_v57 = vpop.f32.mrf.mxu1 }
 0x2c9   : > { %v3129_v58 = vpop.eup %3128  ;;  %3154 = vrcp.f32 %v1601_v40  ;;  %v1604_v14 = vadd.f32 1.0, %v3127_v49  ;;  %2327 = vmatprep.mubr.bf16.mxu1 %v1893_v23  ;;  %2231 = vmatmul.mubr.bf16.gmra.mxu0 %v1890_v17  ;;  %v1232_v15 = vpop.f32.mrf.mxu0 }
 0x2ca   : > { %v3131_v44 = vpop.eup %3130  ;;  %3156 = vrcp.f32 %v1602_v48  ;;  %v1603_v24 = vadd.f32 1.0, %v3129_v58  ;;  %2328 = vmatmul.mubr.bf16.gmra.mxu1 %v1892_v37  ;;  %v1345_v54 = vpop.f32.mrf.mxu1 }
 0x2cb   : > { %v3133_v4 = vpop.eup %3132  ;;  %3158 = vrcp.f32 %v1604_v14  ;;  %v1605_v36 = vadd.f32 1.0, %v3131_v44  ;;  %v1236_v6 = vpop.f32.mrf.mxu0  ;;  %v4421_v44 = vld [vmem:[#allocation38_spill] sm:$0xff] }
 0x2cc   : > { %v3135_v12 = vpop.eup %3134  ;;  %3160 = vrcp.f32 %v1603_v24  ;;  %v1606_v5 = vadd.f32 1.0, %v3133_v4  ;;  %v1349_v33 = vpop.f32.mrf.mxu1 }
 0x2cd   : > { %v3137_v42 = vpop.eup %3136  ;;  %3162 = vrcp.f32 %v1605_v36  ;;  %v1608_v3 = vadd.f32 1.0, %v3135_v12  ;;  %v1238_v39 = vpop.f32.mrf.mxu0 }
 0x2ce   : > { %v3139_v29 = vpop.eup %3138  ;;  %3164 = vrcp.f32 %v1606_v5  ;;  %v1607_v63 = vadd.f32 1.0, %v3137_v42  ;;  %v1351_v40 = vpop.f32.mrf.mxu1 }
 0x2cf   : > { %v3141_v2 = vpop.eup %3140  ;;  %3166 = vrcp.f32 %v1608_v3  ;;  %v1609_v18 = vadd.f32 1.0, %v3139_v29  ;;  %v1240_v5 = vpop.f32.mrf.mxu0 }
 0x2d0   : > { %v3143_v13 = vpop.eup %3142  ;;  %3168 = vrcp.f32 %v1607_v63  ;;  %v1610_v59 = vadd.f32 1.0, %v3141_v2  ;;  %v1353_v3 = vpop.f32.mrf.mxu1 }
 0x2d1   : > { %v3145_v31 = vpop.eup %3144  ;;  %3170 = vrcp.f32 %v1609_v18  ;;  %v1612_v8 = vadd.f32 1.0, %v3143_v13 }
 0x2d2   : > { %v3147_v30 = vpop.eup %3146  ;;  %3172 = vrcp.f32 %v1610_v59  ;;  %v1611_v27 = vadd.f32 1.0, %v3145_v31  ;;  %v1355_v59 = vpop.f32.mrf.mxu1 }
 0x2d3   : > { %v3149_v28 = vpop.eup %3148  ;;  %3174 = vrcp.f32 %v1612_v8  ;;  %v1613_v1 = vadd.f32 1.0, %v3147_v30 }
 0x2d4   : > { %v3151_v19 = vpop.eup %3150  ;;  %3176 = vrcp.f32 %v1611_v27  ;;  %v1790_v49 = vmul.f32 %v3149_v28, %v4384_v20 }
 0x2d5   : > { %v3153_v9 = vpop.eup %3152  ;;  %3178 = vrcp.f32 %v1613_v1 }
 0x2d6   : > { %v3155_v17 = vpop.eup %3154  ;;  %v1791_v26 = vmul.f32 %v3153_v9, %v4402_v55 }
 0x2d7   : > { %v3157_v52 = vpop.eup %3156  ;;  %v1793_v48 = vmul.f32 %v3155_v17, %v4403_v10 }
 0x2d8   : > { %v3159_v50 = vpop.eup %3158  ;;  %v1794_v51 = vmul.f32 %v3157_v52, %v4404_v43  ;;  %v1792_v43 = vmul.f32 %v3151_v19, %v4421_v44  ;;  %v1855_v24 = vmul.f32 %v1791_v26, %v4198_v21 }
 0x2d9   : > { %v3161_v45 = vpop.eup %3160  ;;  %v1796_v0 = vmul.f32 %v3159_v50, %v4405_v34  ;;  %v1854_v34 = vmul.f32 %v1790_v49, %v4193_v32  ;;  %v1242_v32 = vpop.f32.mrf.mxu0 }
 0x2da   : > { %v3163_v41 = vpop.eup %3162  ;;  %v1795_v60 = vmul.f32 %v3161_v45, %v3964_v11  ;;  %v1858_v58 = vmul.f32 %v1794_v51, %v1230_v47  ;;  %v1857_v11 = vmul.f32 %v1793_v48, %v1341_v22  ;;  %v1856_v20 = vmul.f32 %v1792_v43, %v4196_v25 }
 0x2db   : > { %v3165_v23 = vpop.eup %3164  ;;  %v1797_v37 = vmul.f32 %v3163_v41, %v3966_v7  ;;  %v1860_v4 = vmul.f32 %v1796_v0, %v1343_v57 }
 0x2dc   : > { %v3167_v14 = vpop.eup %3166  ;;  %v1859_v55 = vmul.f32 %v1795_v60, %v1232_v15  ;;  %v1894_v47 = vpack.c.bf16 %v1858_v58, %v1854_v34  ;;  %v1798_v31 = vmul.f32 %v3165_v23, %v4406_v38 }
 0x2dd   : > { %v3169_v36 = vpop.eup %3168  ;;  %v1861_v12 = vmul.f32 %v1797_v37, %v1345_v54  ;;  %v1896_v2 = vpack.c.bf16 %v1860_v4, %v1856_v20 }
 0x2de   : > { %v3171_v42 = vpop.eup %3170  ;;  %v1895_v10 = vpack.c.bf16 %v1859_v55, %v1855_v24  ;;  %v1799_v18 = vmul.f32 %v3169_v36, %v3982_v61  ;;  %v1862_v1 = vmul.f32 %v1798_v31, %v1236_v6 }
 0x2df   : > { %v3173_v7 = vpop.eup %3172  ;;  %v1897_v29 = vpack.c.bf16 %v1861_v12, %v1857_v11  ;;  %v1801_v8 = vmul.f32 %v3171_v42, %v4408_v35 }
 0x2e0   : > { %v3175_v63 = vpop.eup %3174  ;;  %2238 = vmatprep.mubr.bf16.mxu0 %v1895_v10  ;;  %v1802_v57 = vmul.f32 %v3173_v7, %v3996_v46  ;;  %v1800_v46 = vmul.f32 %v3167_v14, %v4407_v16  ;;  %v1863_v27 = vmul.f32 %v1799_v18, %v1238_v39 }
 0x2e1   : > { %v3177_v21 = vpop.eup %3176  ;;  %2335 = vmatprep.mubr.bf16.mxu1 %v1897_v29  ;;  %2239 = vmatmul.mubr.bf16.gmra.mxu0 %v1894_v47  ;;  %v1804_v13 = vmul.f32 %v3175_v63, %v4412_v53  ;;  %v1865_v61 = vmul.f32 %v1801_v8, %v1351_v40 }
 0x2e2   : > { %v3179_v22 = vpop.eup %3178  ;;  %v1803_v25 = vmul.f32 %v3177_v21, %v4413_v56  ;;  %2336 = vmatmul.mubr.bf16.gmra.mxu1 %v1896_v2  ;;  %v1866_v30 = vmul.f32 %v1802_v57, %v1240_v5  ;;  %v1864_v53 = vmul.f32 %v1800_v46, %v1349_v33 }
 0x2e3   : > { %v1805_v15 = vmul.f32 %v3179_v22, %v4414_v62  ;;  %v1868_v54 = vmul.f32 %v1804_v13, %v1353_v3 }
 0x2e4   : > { %v1867_v28 = vmul.f32 %v1803_v25, %v1242_v32  ;;  %v1898_v56 = vpack.c.bf16 %v1866_v30, %v1862_v1 }
 0x2e5   : > { %v1869_v19 = vmul.f32 %v1805_v15, %v1355_v59  ;;  %v1900_v52 = vpack.c.bf16 %v1868_v54, %v1864_v53 }
 0x2e6   : > { %v1899_v9 = vpack.c.bf16 %v1867_v28, %v1863_v27 }
 0x2e7   : > { %v1901_v17 = vpack.c.bf16 %v1869_v19, %v1865_v61 }
 0x2e8   : > { %2246 = vmatprep.mubr.bf16.mxu0 %v1899_v9 }
 0x2e9   : > { %2343 = vmatprep.mubr.bf16.mxu1 %v1901_v17  ;;  %2247 = vmatmul.mubr.bf16.gmra.mxu0 %v1898_v56 }
 0x2ea   : > { %2344 = vmatmul.mubr.bf16.gmra.mxu1 %v1900_v52 }
 0x35f   : > { %v2672_v38 = vpop.f32.mrf.mxu0 }
 0x360   : > { %v2736_v35 = vpop.f32.mrf.mxu1 }
 0x361   : > { %v2673_v62 = vpop.f32.mrf.mxu0 }
 0x362   : > { %v2737_v16 = vpop.f32.mrf.mxu1  ;;  %v2674_v50 = vadd.f32 %v2673_v62, %v2672_v38 }
 0x363   : > { %v2738_v45 = vadd.f32 %v2737_v16, %v2736_v35  ;;  %v2675_v51 = vpop.f32.mrf.mxu0 }
 0x364   : > { %v2739_v6 = vpop.f32.mrf.mxu1 }
 0x365   : > { %v2290_v39 = vadd.f32 %v2738_v45, %v2674_v50  ;;  %v2676_v41 = vpop.f32.mrf.mxu0 }
 0x366   : > { %v2740_v33 = vpop.f32.mrf.mxu1  ;;  %v2677_v26 = vadd.f32 %v2676_v41, %v2675_v51 }
 0x367   : > { %2352 = vst [vmem:[%s4221_s13] sm:$0xff] %v2290_v39  ;;  %v2741_v0 = vadd.f32 %v2740_v33, %v2739_v6  ;;  %v2678_v60 = vpop.f32.mrf.mxu0 }
 0x368   : > { %v2742_v40 = vpop.f32.mrf.mxu1 }
 0x369   : > { %v2293_v23 = vadd.f32 %v2741_v0, %v2677_v26  ;;  %v2679_v49 = vpop.f32.mrf.mxu0 }
 0x36a   : > { %v2743_v48 = vpop.f32.mrf.mxu1  ;;  %v2680_v37 = vadd.f32 %v2679_v49, %v2678_v60 }
 0x36b   : > { %2353 = vst [vmem:[%s4221_s13 + $0x8] sm:$0xff] %v2293_v23  ;;  %v2744_v58 = vadd.f32 %v2743_v48, %v2742_v40  ;;  %v2681_v14 = vpop.f32.mrf.mxu0 }
 0x36c   : > { %v2745_v44 = vpop.f32.mrf.mxu1 }
 0x36d   : > { %v2298_v43 = vadd.f32 %v2744_v58, %v2680_v37  ;;  %v2682_v24 = vpop.f32.mrf.mxu0 }
 0x36e   : > { %v2746_v4 = vpop.f32.mrf.mxu1  ;;  %v2683_v55 = vadd.f32 %v2682_v24, %v2681_v14 }
 0x36f   : > { %2354 = vst [vmem:[%s4221_s13 + $0x10] sm:$0xff] %v2298_v43  ;;  %v2747_v36 = vadd.f32 %v2746_v4, %v2745_v44  ;;  %v2684_v34 = vpop.f32.mrf.mxu0 }
 0x370   : > { %v2748_v11 = vpop.f32.mrf.mxu1 }
 0x371   : > { %v2301_v12 = vadd.f32 %v2747_v36, %v2683_v55  ;;  %v2685_v5 = vpop.f32.mrf.mxu0 }
 0x372   : > { %v2749_v42 = vpop.f32.mrf.mxu1  ;;  %v2686_v20 = vadd.f32 %v2685_v5, %v2684_v34 }
 0x373   : > { %2355 = vst [vmem:[%s4221_s13 + $0x18] sm:$0xff] %v2301_v12  ;;  %v2750_v10 = vadd.f32 %v2749_v42, %v2748_v11  ;;  %v2687_v3 = vpop.f32.mrf.mxu0 }
 0x374   : > { %v2751_v7 = vpop.f32.mrf.mxu1 }
 0x375   : > { %v2306_v47 = vadd.f32 %v2750_v10, %v2686_v20  ;;  %v2688_v29 = vpop.f32.mrf.mxu0 }
 0x376   : > { %v2752_v63 = vpop.f32.mrf.mxu1  ;;  %v2689_v2 = vadd.f32 %v2688_v29, %v2687_v3 }
 0x377   : > { %2356 = vst [vmem:[%s4221_s13 + $0x20] sm:$0xff] %v2306_v47  ;;  %v2753_v21 = vadd.f32 %v2752_v63, %v2751_v7  ;;  %v2690_v57 = vpop.f32.mrf.mxu0 }
 0x378   : > { %v2754_v32 = vpop.f32.mrf.mxu1 }
 0x379   : > { %v2309_v22 = vadd.f32 %v2753_v21, %v2689_v2  ;;  %v2691_v18 = vpop.f32.mrf.mxu0 }
 0x37a   : > { %v2755_v13 = vpop.f32.mrf.mxu1  ;;  %v2692_v25 = vadd.f32 %v2691_v18, %v2690_v57 }
 0x37b   : > { %2357 = vst [vmem:[%s4221_s13 + $0x28] sm:$0xff] %v2309_v22  ;;  %v2756_v59 = vadd.f32 %v2755_v13, %v2754_v32  ;;  %v2693_v31 = vpop.f32.mrf.mxu0 }
 0x37c   : > { %v2757_v8 = vpop.f32.mrf.mxu1 }
 0x37d   : > { %v2314_v15 = vadd.f32 %v2756_v59, %v2692_v25  ;;  %v2694_v30 = vpop.f32.mrf.mxu0 }
 0x37e   : > { %v2758_v46 = vpop.f32.mrf.mxu1  ;;  %v2695_v27 = vadd.f32 %v2694_v30, %v2693_v31 }
 0x37f   : > { %2358 = vst [vmem:[%s4221_s13 + $0x30] sm:$0xff] %v2314_v15  ;;  %v2759_v54 = vadd.f32 %v2758_v46, %v2757_v8 }
 0x381   : > { %v2317_v28 = vadd.f32 %v2759_v54, %v2695_v27  ;;  %v2696_v1 = vpop.f32.mrf.mxu0 }
 0x382   : > { %v2760_v61 = vpop.f32.mrf.mxu1 }
 0x383   : > { %2359 = vst [vmem:[%s4221_s13 + $0x38] sm:$0xff] %v2317_v28  ;;  %v2697_v19 = vpop.f32.mrf.mxu0 }
 0x384   : > { %v2698_v53 = vadd.f32 %v2697_v19, %v2696_v1  ;;  %v2761_v9 = vpop.f32.mrf.mxu1 }
 0x385   : > { %v2762_v56 = vadd.f32 %v2761_v9, %v2760_v61  ;;  %v2699_v17 = vpop.f32.mrf.mxu0 }
 0x386   : > { %v2763_v52 = vpop.f32.mrf.mxu1 }
 0x387   : > { %v2322_v38 = vadd.f32 %v2762_v56, %v2698_v53  ;;  %v2700_v35 = vpop.f32.mrf.mxu0 }
 0x388   : > { %v2701_v62 = vadd.f32 %v2700_v35, %v2699_v17  ;;  %v2764_v16 = vpop.f32.mrf.mxu1 }
 0x389   : > { %2360 = vst [vmem:[%s4221_s13 + $0x40] sm:$0xff] %v2322_v38  ;;  %v2765_v50 = vadd.f32 %v2764_v16, %v2763_v52  ;;  %v2702_v45 = vpop.f32.mrf.mxu0 }
 0x38a   : > { %v2766_v51 = vpop.f32.mrf.mxu1 }
 0x38b   : > { %v2325_v6 = vadd.f32 %v2765_v50, %v2701_v62  ;;  %v2703_v39 = vpop.f32.mrf.mxu0 }
 0x38c   : > { %v2704_v41 = vadd.f32 %v2703_v39, %v2702_v45  ;;  %v2767_v33 = vpop.f32.mrf.mxu1 }
 0x38d   : > { %2361 = vst [vmem:[%s4221_s13 + $0x48] sm:$0xff] %v2325_v6  ;;  %v2768_v26 = vadd.f32 %v2767_v33, %v2766_v51  ;;  %v2705_v0 = vpop.f32.mrf.mxu0 }
 0x38e   : > { %v2769_v60 = vpop.f32.mrf.mxu1 }
 0x38f   : > { %v2330_v40 = vadd.f32 %v2768_v26, %v2704_v41  ;;  %v2706_v23 = vpop.f32.mrf.mxu0 }
 0x390   : > { %v2707_v49 = vadd.f32 %v2706_v23, %v2705_v0  ;;  %v2770_v48 = vpop.f32.mrf.mxu1 }
 0x391   : > { %2362 = vst [vmem:[%s4221_s13 + $0x50] sm:$0xff] %v2330_v40  ;;  %v2771_v37 = vadd.f32 %v2770_v48, %v2769_v60 }
 0x393   : > { %v2333_v58 = vadd.f32 %v2771_v37, %v2707_v49 }
 0x395   : > { %2363 = vst [vmem:[%s4221_s13 + $0x58] sm:$0xff] %v2333_v58 }
 0x3a1   : > { %v2708_v14 = vpop.f32.mrf.mxu0 }
 0x3a2   : > { %v2772_v44 = vpop.f32.mrf.mxu1 }
 0x3a3   : > { %v2709_v43 = vpop.f32.mrf.mxu0 }
 0x3a4   : > { %v2710_v24 = vadd.f32 %v2709_v43, %v2708_v14  ;;  %v2773_v4 = vpop.f32.mrf.mxu1 }
 0x3a5   : > { %v2774_v55 = vadd.f32 %v2773_v4, %v2772_v44  ;;  %v2711_v36 = vpop.f32.mrf.mxu0 }
 0x3a6   : > { %v2775_v34 = vpop.f32.mrf.mxu1 }
 0x3a7   : > { %v2338_v11 = vadd.f32 %v2774_v55, %v2710_v24  ;;  %v2712_v12 = vpop.f32.mrf.mxu0 }
 0x3a8   : > { %v2713_v5 = vadd.f32 %v2712_v12, %v2711_v36  ;;  %v2776_v42 = vpop.f32.mrf.mxu1 }
 0x3a9   : > { %2364 = vst [vmem:[%s4221_s13 + $0x60] sm:$0xff] %v2338_v11  ;;  %v2777_v20 = vadd.f32 %v2776_v42, %v2775_v34  ;;  %v2714_v10 = vpop.f32.mrf.mxu0 }
 0x3aa   : > { %v2778_v3 = vpop.f32.mrf.mxu1 }
 0x3ab   : > { %v2341_v7 = vadd.f32 %v2777_v20, %v2713_v5  ;;  %v2715_v47 = vpop.f32.mrf.mxu0 }
 0x3ac   : > { %v2716_v29 = vadd.f32 %v2715_v47, %v2714_v10  ;;  %v2779_v63 = vpop.f32.mrf.mxu1 }
 0x3ad   : > { %2365 = vst [vmem:[%s4221_s13 + $0x68] sm:$0xff] %v2341_v7  ;;  %v2780_v2 = vadd.f32 %v2779_v63, %v2778_v3  ;;  %v2717_v21 = vpop.f32.mrf.mxu0 }
 0x3ae   : > { %v2781_v57 = vpop.f32.mrf.mxu1 }
 0x3af   : > { %v2346_v32 = vadd.f32 %v2780_v2, %v2716_v29  ;;  %v2718_v22 = vpop.f32.mrf.mxu0 }
 0x3b0   : > { %v2719_v18 = vadd.f32 %v2718_v22, %v2717_v21  ;;  %v2782_v13 = vpop.f32.mrf.mxu1 }
 0x3b1   : > { %2366 = vst [vmem:[%s4221_s13 + $0x70] sm:$0xff] %v2346_v32  ;;  %v2783_v25 = vadd.f32 %v2782_v13, %v2781_v57 }
 0x3b3   : > { %v2349_v59 = vadd.f32 %v2783_v25, %v2719_v18 }
 0x3b5   : > { %2367 = vst [vmem:[%s4221_s13 + $0x78] sm:$0xff] %v2349_v59 }
 0x3b6   : > { %3273 = shalt.err (!%p3270_p9)
}
 0x3b7   : > { %s3274_s6 = scalar_lea.hbm %s4243_s11, 2048  ;;  %s3278_s10 = scalar_lea.hbm %s4294_s5, 4096 }
 0x3b8   : > { %p3275_p13 = scmp.ne.s32.totalorder %s4243_s11, %s3274_s6  ;;  %p3279_p4 = scmp.lt.s32.totalorder %s4243_s11, %s4294_s5 }
 0x3b9   : > { %p3280_p8 = scmp.lt.s32.totalorder %s3278_s10, %s3274_s6 }
 0x3ba   : > { %p3276_p5 = pnand %p3275_p13, %p4422_p10 }
 0x3bb   : > { %p3281_p7 = por %p3280_p8, %p3279_p4 }
 0x3bc   : > { %p3277_p0 = pneg %p3276_p5 }
 0x3be   : > { %p3282_p11 = pnand %p3281_p7, %p3277_p0 }
 0x3c0   : > { %3285 = shalt.err (!%p3282_p11)
}
 0x3c1   : > { %s3341_s14 = smov 128   ;;  %s3342_s8 = smov 8  }
 0x3c2   : > { %2794 = dma.vmem_to_hbm [thread:$0]  (%p4422_p10), %s4245_s29, 2048, %s4243_s11, %s2369_s15, %s3341_s14, %s3341_s14, %s3342_s8  }
 0x3c3 PF: > { %s2397_s9 = sand.u32 1, %s3316_s18   ;;  %p4423_p1 = scmp.ne.s32.totalorder %s4337_s25, 0 }
 0x3c4   : > { %p4424_p2 = scmp.ge.s32.totalorder %s3328_s21, 2  ;;  %s2398_s16 = scalar_lea.sflag [#allocation4], %s2397_s9 }
 0x3c6   : > { %p2808_p6 = pnand %p4424_p2, %p4423_p1 }
 0x3c8   : > { %p2809_p12 = pneg %p2808_p6 }
 0x3ca   : > { %3311 = dma.done.wait (%p2809_p12), %s2398_s16, 2048  }
 0x3cb   : > { %3313 = vsyncadd (%p2809_p12), %s2398_s16, 4294965248  ;;  %p19_p3 = scmp.ge.s32.totalorder %s3445_s17, 4   ;;  %s4425_s18 = smov %s3320_s19 }
 0x3cc   : > { %s4426_s19 = smov %s3324_s20  ;;  %s4427_s20 = smov %s3454_s28 }
 0x3cd   : > { %s4428_s21 = smov %s3445_s17  ;;  %21 = sbr.rel (!%p19_p3) target bundleno = 6 (0x6), region = 93 }
 0x3d2   :  { %2403 = vsyncpa [#allocation3], 1 }
 0x3d3   :  { %2405 = vsyncpa [#allocation3 + $0x1], 1 }
 0x3d4   :  { %2406 = vsyncpa [#allocation6], 1 }
 0x3d5   :  { %2407 = vsyncpa [#allocation4], 1 }
 0x3d6   :  { %2409 = vsyncpa [#allocation4 + $0x1], 1 }

</bundles_post_ra>
